<compile_context>
chip_gen: v7x
topology: tpu7x:2x2x1
jax: 0.10.0
libtpu: 0.0.40
codegen_flags: <defaults>
</compile_context>

<pallas_src>
import functools
import math

import jax
import jax.numpy as jnp
from jax.experimental import pallas as pl
from jax.experimental.pallas import tpu as pltpu

_LOG2 = math.log(2.0)


def _mha_graph_kernel(num_heads, dk, dv,
                      node_ref, edge_ref, row_ref, col_ref,
                      wq_ref, wk_ref, wv_ref,
                      wkn1_ref, bkn1_ref, wkn2_ref, bkn2_ref, wkl_ref, bkl_ref,
                      wvn1_ref, bvn1_ref, wvn2_ref, bvn2_ref, wvl_ref, bvl_ref,
                      wc_ref, bc_ref, wo_ref, bo_ref, gamma_ref, beta_ref,
                      out_ref, aggr_ref):
    f32 = jnp.float32
    x = node_ref[...]                      # (N, Dh)
    e_attr = edge_ref[...]                 # (E, De)
    N = x.shape[0]
    E = e_attr.shape[0]
    H = num_heads

    def mm(a, b):
        return jnp.dot(a, b, preferred_element_type=jnp.float32)

    def ssp(t):  # ShiftedSoftplus, numerically stable
        return jnp.maximum(t, 0.0) + jnp.log(1.0 + jnp.exp(-jnp.abs(t))) - _LOG2

    # Grouped Conv1d(k=1) projections == block-diagonal matmuls (single MXU op each).
    hq = mm(x, wq_ref[...])                # (N, Dk)   head-major
    hk = mm(x, wk_ref[...])                # (N, Dk)
    hv = mm(x, wv_ref[...])                # (N, Dh)

    # Per-edge modulation MLPs.  The 2nd layer's weights are pre-tiled across
    # heads in the wrapper, so the "broadcast over heads" needs no in-kernel tile.
    wk_e = mm(ssp(mm(e_attr, wkn1_ref[...]) + bkn1_ref[...]), wkn2_ref[...]) + bkn2_ref[...]  # (E, Dk)
    wv_e = mm(ssp(mm(e_attr, wvn1_ref[...]) + bvn1_ref[...]), wvn2_ref[...]) + bvn2_ref[...]  # (E, Dh)

    # Gather source-node keys/values per edge with a one-hot matmul (MXU).
    col = col_ref[...]                                                     # (E, 1) int32
    src_onehot = (col == jax.lax.broadcasted_iota(jnp.int32, (E, N), 1)).astype(f32)
    k_src = mm(src_onehot, hk)                                             # (E, Dk)
    v_src = mm(src_onehot, hv)                                             # (E, Dh)

    # weight_k_lin / weight_v_lin applied per head via block-diagonal weights.
    keys_e = mm(wk_e * k_src, wkl_ref[...]) + bkl_ref[...]                 # (E, Dk)
    msg_e = mm(wv_e * v_src, wvl_ref[...]) + bvl_ref[...]                  # (E, Dh)

    # Destination mask / additive bias, hoisted out of the head loop.
    row = row_ref[...]                                                     # (1, E) int32
    dest_iota = jax.lax.broadcasted_iota(jnp.int32, (N, E), 0)
    on_dest = row == dest_iota                                             # (N, E) bool
    a_mask = on_dest.astype(f32)
    bias = jnp.where(on_dest, f32(0.0), f32(-1e9))

    inv_scale = f32(1.0 / math.sqrt(dk))

    # Per-head scatter-softmax + aggregation, formulated densely over
    # (destination node, edge); exact for arbitrary (multi-)graphs.
    for h in range(H):
        q_h = hq[:, h * dk:(h + 1) * dk]                                   # (N, dk)
        k_h = keys_e[:, h * dk:(h + 1) * dk]                               # (E, dk)
        # contract last dims of both operands -> no transpose feeding the MXU
        s = jax.lax.dot_general(q_h, k_h, (((1,), (1,)), ((), ())),
                                preferred_element_type=jnp.float32)        # (N, E)
        s = s * inv_scale + bias
        m = jnp.max(s, axis=-1, keepdims=True)
        p = jnp.exp(s - m) * a_mask
        denom = jnp.sum(p, axis=-1, keepdims=True)
        # nodes with no incoming edges get alpha == 0 (matches scatter_sum ref)
        alpha = p * (1.0 / jnp.where(denom > 0.0, denom, f32(1.0)))
        aggr_ref[:, h * dv:(h + 1) * dv] = mm(alpha, msg_e[:, h * dv:(h + 1) * dv])

    aggr = aggr_ref[...]                                                   # (N, Dh)

    # centroid residual + ShiftedSoftplus + out_transform + LayerNorm.
    pre = mm(x, wc_ref[...]) + bc_ref[...] + aggr
    act = ssp(pre)
    out = mm(act, wo_ref[...]) + bo_ref[...]
    mu = jnp.mean(out, axis=-1, keepdims=True)
    var = jnp.mean((out - mu) ** 2, axis=-1, keepdims=True)
    y = (out - mu) * jax.lax.rsqrt(var + 1e-5)
    out_ref[...] = y * gamma_ref[...] + beta_ref[...]


def _block_diag(blocks):
    """(H, din, dout) per-head weights -> (H*din, H*dout) block-diagonal."""
    H, din, dout = blocks.shape
    out = jnp.zeros((H * din, H * dout), blocks.dtype)
    for h in range(H):
        out = out.at[h * din:(h + 1) * din, h * dout:(h + 1) * dout].set(blocks[h])
    return out


def multi_head_attention(node_attr, edge_index, edge_attr, params, num_heads):
    N, Dh = node_attr.shape
    E, _ = edge_attr.shape
    H = num_heads
    dk = params["wq_heads"].shape[-1]
    dv = params["wv_heads"].shape[-1]

    row, col = edge_index
    row_r = row.reshape(1, E).astype(jnp.int32)   # destination index per edge (lane layout)
    col_c = col.reshape(E, 1).astype(jnp.int32)   # source index per edge (sublane layout)

    # Grouped Conv1d(k=1) projections -> block-diagonal (in, out) matrices.
    wq_bd = _block_diag(params["wq_heads"])                            # (Dh, Dk)
    wk_bd = _block_diag(params["wk_heads"])                            # (Dh, Dk)
    wv_bd = _block_diag(params["wv_heads"])                            # (Dh, Dh)
    # weight_k_lin / weight_v_lin (shared across heads) -> block diagonal.
    wkl_bd = _block_diag(jnp.broadcast_to(params["wkl"], (H, dk, dk)))  # (Dk, Dk)
    wvl_bd = _block_diag(jnp.broadcast_to(params["wvl"], (H, dv, dv)))  # (Dh, Dh)
    bkl_t = jnp.tile(params["bkl"][None, :], (1, H))                    # (1, Dk)
    bvl_t = jnp.tile(params["bvl"][None, :], (1, H))                    # (1, Dh)
    # Fold the broadcast of W_k / W_v over heads into the 2nd edge-MLP layer.
    wkn2_t = jnp.tile(params["wkn2"], (1, H))                           # (dk, Dk)
    bkn2_t = jnp.tile(params["bkn2"][None, :], (1, H))                  # (1, Dk)
    wvn2_t = jnp.tile(params["wvn2"], (1, H))                           # (dv, Dh)
    bvn2_t = jnp.tile(params["bvn2"][None, :], (1, H))                  # (1, Dh)

    args = (
        node_attr, edge_attr, row_r, col_c,
        wq_bd, wk_bd, wv_bd,
        params["wkn1"], params["bkn1"][None, :], wkn2_t, bkn2_t, wkl_bd, bkl_t,
        params["wvn1"], params["bvn1"][None, :], wvn2_t, bvn2_t, wvl_bd, bvl_t,
        params["wc"], params["bc"][None, :],
        params["wo"], params["bo"][None, :],
        params["gamma"][None, :], params["beta"][None, :],
    )

    in_specs = [pl.BlockSpec(a.shape, lambda i: (0, 0)) for a in args]

    return pl.pallas_call(
        functools.partial(_mha_graph_kernel, H, dk, dv),
        out_shape=jax.ShapeDtypeStruct((N, Dh), jnp.float32),
        grid_spec=pltpu.PrefetchScalarGridSpec(
            num_scalar_prefetch=0,
            grid=(1,),
            in_specs=in_specs,
            out_specs=pl.BlockSpec((N, Dh), lambda i: (0, 0)),
            scratch_shapes=[pltpu.VMEM((N, Dh), jnp.float32)],
        ),
        compiler_params=pltpu.CompilerParams(
            dimension_semantics=("arbitrary",)),
    )(*args)


def _reference(node_attr, edge_index, edge_attr, p, H):
    """Pure-JAX mirror of the PyTorch forward (edge-list / scatter form)."""
    N, Dh = node_attr.shape
    row, col = edge_index
    dk = p["wq_heads"].shape[-1]
    dv = p["wv_heads"].shape[-1]

    def ssp(t):
        return jax.nn.softplus(t) - math.log(2.0)

    def grouped(x, blocks):  # grouped Conv1d(k=1): (N, H*din) -> (N, H, dout)
        Hh, din, _ = blocks.shape
        return jnp.einsum("nhd,hdo->nho", x.reshape(N, Hh, din), blocks)

    hq = grouped(node_attr, p["wq_heads"])     # (N, H, dk)
    hk = grouped(node_attr, p["wk_heads"])     # (N, H, dk)
    hv = grouped(node_attr, p["wv_heads"])     # (N, H, dv)

    Wk = ssp(edge_attr @ p["wkn1"] + p["bkn1"]) @ p["wkn2"] + p["bkn2"]   # (E, dk)
    Wv = ssp(edge_attr @ p["wvn1"] + p["bvn1"]) @ p["wvn2"] + p["bvn2"]   # (E, dv)

    keys_j = (Wk[:, None, :] * hk[col]) @ p["wkl"] + p["bkl"]             # (E, H, dk)
    queries_i = hq[row]                                                   # (E, H, dk)
    qk = (queries_i * keys_j).sum(-1) / math.sqrt(dk)                     # (E, H)

    m = jnp.full((N, H), -jnp.inf, jnp.float32).at[row].max(qk)
    ex = jnp.exp(qk - m[row])
    den = jnp.zeros((N, H), jnp.float32).at[row].add(ex)
    alpha = ex / den[row]                                                 # (E, H)

    msg = (Wv[:, None, :] * hv[col]) @ p["wvl"] + p["bvl"]                # (E, H, dv)
    msg = alpha[..., None] * msg
    aggr = jnp.zeros((N, H, dv), jnp.float32).at[row].add(msg).reshape(N, Dh)

    out = node_attr @ p["wc"] + p["bc"] + aggr
    out = ssp(out) @ p["wo"] + p["bo"]
    mu = out.mean(-1, keepdims=True)
    var = ((out - mu) ** 2).mean(-1, keepdims=True)
    y = (out - mu) / jnp.sqrt(var + 1e-5)
    return y * p["gamma"] + p["beta"]


if __name__ == "__main__":
    N, E = 16, 48
    hidden_channels, edge_channels, key_channels, num_heads = 32, 8, 16, 4
    dk = key_channels // num_heads      # 4
    dv = hidden_channels // num_heads   # 8
    dh_in = hidden_channels // num_heads

    key = jax.random.PRNGKey(0)
    ks = jax.random.split(key, 32)

    node_attr = jax.random.normal(ks[0], (N, hidden_channels), jnp.float32)
    edge_attr = jax.random.normal(ks[1], (E, edge_channels), jnp.float32)
    row = jax.random.randint(ks[2], (E,), 0, N)
    col = jax.random.randint(ks[3], (E,), 0, N)

    def w(k, din, dout):
        return jax.random.normal(k, (din, dout), jnp.float32) / math.sqrt(din)

    def b(k, dout):
        return 0.1 * jax.random.normal(k, (dout,), jnp.float32)

    params = dict(
        wq_heads=jax.random.normal(ks[4], (num_heads, dh_in, dk), jnp.float32) / math.sqrt(dh_in),
        wk_heads=jax.random.normal(ks[5], (num_heads, dh_in, dk), jnp.float32) / math.sqrt(dh_in),
        wv_heads=jax.random.normal(ks[6], (num_heads, dh_in, dv), jnp.float32) / math.sqrt(dh_in),
        wkn1=w(ks[7], edge_channels, dk), bkn1=b(ks[8], dk),
        wkn2=w(ks[9], dk, dk), bkn2=b(ks[10], dk),
        wkl=w(ks[11], dk, dk), bkl=b(ks[12], dk),
        wvn1=w(ks[13], edge_channels, dv), bvn1=b(ks[14], dv),
        wvn2=w(ks[15], dv, dv), bvn2=b(ks[16], dv),
        wvl=w(ks[17], dv, dv), bvl=b(ks[18], dv),
        wc=w(ks[19], hidden_channels, hidden_channels), bc=b(ks[20], hidden_channels),
        wo=w(ks[21], hidden_channels, hidden_channels), bo=b(ks[22], hidden_channels),
        gamma=1.0 + 0.1 * jax.random.normal(ks[23], (hidden_channels,), jnp.float32),
        beta=0.1 * jax.random.normal(ks[24], (hidden_channels,), jnp.float32),
    )

    out = multi_head_attention(node_attr, (row, col), edge_attr, params, num_heads)
    out = jax.block_until_ready(out)

    with jax.default_matmul_precision("highest"):
        ref = _reference(node_attr, (row, col), edge_attr, params, num_heads)
    ref = jax.block_until_ready(ref)

    assert out.shape == (N, hidden_channels)
    assert bool(jnp.all(jnp.isfinite(out))), "non-finite output"
    max_err = float(jnp.max(jnp.abs(out - ref)))
    assert jnp.allclose(out, ref, atol=1e-3, rtol=1e-3), f"mismatch vs reference (max abs err {max_err})"

    print("KERNEL_OK")
</pallas_src>

<mosaic_0001>
module attributes {stable_mosaic.version = 11 : i64} {
  func.func @_mha_graph_kernel(%arg0: i32, %arg1: memref<16x32xf32, #tpu.memory_space<vmem>>, %arg2: memref<48x8xf32, #tpu.memory_space<vmem>>, %arg3: memref<1x48xi32, #tpu.memory_space<vmem>>, %arg4: memref<48x1xi32, #tpu.memory_space<vmem>>, %arg5: memref<32x16xf32, #tpu.memory_space<vmem>>, %arg6: memref<32x16xf32, #tpu.memory_space<vmem>>, %arg7: memref<32x32xf32, #tpu.memory_space<vmem>>, %arg8: memref<8x4xf32, #tpu.memory_space<vmem>>, %arg9: memref<1x4xf32, #tpu.memory_space<vmem>>, %arg10: memref<4x16xf32, #tpu.memory_space<vmem>>, %arg11: memref<1x16xf32, #tpu.memory_space<vmem>>, %arg12: memref<16x16xf32, #tpu.memory_space<vmem>>, %arg13: memref<1x16xf32, #tpu.memory_space<vmem>>, %arg14: memref<8x8xf32, #tpu.memory_space<vmem>>, %arg15: memref<1x8xf32, #tpu.memory_space<vmem>>, %arg16: memref<8x32xf32, #tpu.memory_space<vmem>>, %arg17: memref<1x32xf32, #tpu.memory_space<vmem>>, %arg18: memref<32x32xf32, #tpu.memory_space<vmem>>, %arg19: memref<1x32xf32, #tpu.memory_space<vmem>>, %arg20: memref<32x32xf32, #tpu.memory_space<vmem>>, %arg21: memref<1x32xf32, #tpu.memory_space<vmem>>, %arg22: memref<32x32xf32, #tpu.memory_space<vmem>>, %arg23: memref<1x32xf32, #tpu.memory_space<vmem>>, %arg24: memref<1x32xf32, #tpu.memory_space<vmem>>, %arg25: memref<1x32xf32, #tpu.memory_space<vmem>>, %arg26: memref<16x32xf32, #tpu.memory_space<vmem>>, %arg27: memref<16x32xf32, #tpu.memory_space<vmem>>) attributes {dimension_semantics = [#tpu.dimension_semantics<arbitrary>], iteration_bounds = array<i64: 1>, scalar_prefetch = 0 : i64, scratch_operands = 1 : i64, tpu.core_type = #tpu.core_type<tc>, window_params = [{pipeline_mode = #tpu.pipeline_mode<synchronous>, transform_indices = @transform_0, window_bounds = array<i64: 16, 32>}, {pipeline_mode = #tpu.pipeline_mode<synchronous>, transform_indices = @transform_1, window_bounds = array<i64: 48, 8>}, {pipeline_mode = #tpu.pipeline_mode<synchronous>, transform_indices = @transform_2, window_bounds = array<i64: 1, 48>}, {pipeline_mode = #tpu.pipeline_mode<synchronous>, transform_indices = @transform_3, window_bounds = array<i64: 48, 1>}, {pipeline_mode = #tpu.pipeline_mode<synchronous>, transform_indices = @transform_4, window_bounds = array<i64: 32, 16>}, {pipeline_mode = #tpu.pipeline_mode<synchronous>, transform_indices = @transform_5, window_bounds = array<i64: 32, 16>}, {pipeline_mode = #tpu.pipeline_mode<synchronous>, transform_indices = @transform_6, window_bounds = array<i64: 32, 32>}, {pipeline_mode = #tpu.pipeline_mode<synchronous>, transform_indices = @transform_7, window_bounds = array<i64: 8, 4>}, {pipeline_mode = #tpu.pipeline_mode<synchronous>, transform_indices = @transform_8, window_bounds = array<i64: 1, 4>}, {pipeline_mode = #tpu.pipeline_mode<synchronous>, transform_indices = @transform_9, window_bounds = array<i64: 4, 16>}, {pipeline_mode = #tpu.pipeline_mode<synchronous>, transform_indices = @transform_10, window_bounds = array<i64: 1, 16>}, {pipeline_mode = #tpu.pipeline_mode<synchronous>, transform_indices = @transform_11, window_bounds = array<i64: 16, 16>}, {pipeline_mode = #tpu.pipeline_mode<synchronous>, transform_indices = @transform_12, window_bounds = array<i64: 1, 16>}, {pipeline_mode = #tpu.pipeline_mode<synchronous>, transform_indices = @transform_13, window_bounds = array<i64: 8, 8>}, {pipeline_mode = #tpu.pipeline_mode<synchronous>, transform_indices = @transform_14, window_bounds = array<i64: 1, 8>}, {pipeline_mode = #tpu.pipeline_mode<synchronous>, transform_indices = @transform_15, window_bounds = array<i64: 8, 32>}, {pipeline_mode = #tpu.pipeline_mode<synchronous>, transform_indices = @transform_16, window_bounds = array<i64: 1, 32>}, {pipeline_mode = #tpu.pipeline_mode<synchronous>, transform_indices = @transform_17, window_bounds = array<i64: 32, 32>}, {pipeline_mode = #tpu.pipeline_mode<synchronous>, transform_indices = @transform_18, window_bounds = array<i64: 1, 32>}, {pipeline_mode = #tpu.pipeline_mode<synchronous>, transform_indices = @transform_19, window_bounds = array<i64: 32, 32>}, {pipeline_mode = #tpu.pipeline_mode<synchronous>, transform_indices = @transform_20, window_bounds = array<i64: 1, 32>}, {pipeline_mode = #tpu.pipeline_mode<synchronous>, transform_indices = @transform_21, window_bounds = array<i64: 32, 32>}, {pipeline_mode = #tpu.pipeline_mode<synchronous>, transform_indices = @transform_22, window_bounds = array<i64: 1, 32>}, {pipeline_mode = #tpu.pipeline_mode<synchronous>, transform_indices = @transform_23, window_bounds = array<i64: 1, 32>}, {pipeline_mode = #tpu.pipeline_mode<synchronous>, transform_indices = @transform_24, window_bounds = array<i64: 1, 32>}, {pipeline_mode = #tpu.pipeline_mode<synchronous>, transform_indices = @transform_25, window_bounds = array<i64: 16, 32>}]} {
    %c0 = arith.constant 0 : index
    %c0_0 = arith.constant 0 : index
    %0 = vector.load %arg1[%c0, %c0_0] : memref<16x32xf32, #tpu.memory_space<vmem>>, vector<16x32xf32>
    %c0_1 = arith.constant 0 : index
    %c0_2 = arith.constant 0 : index
    %1 = vector.load %arg2[%c0_1, %c0_2] : memref<48x8xf32, #tpu.memory_space<vmem>>, vector<48x8xf32>
    %c0_3 = arith.constant 0 : index
    %c0_4 = arith.constant 0 : index
    %2 = vector.load %arg5[%c0_3, %c0_4] : memref<32x16xf32, #tpu.memory_space<vmem>>, vector<32x16xf32>
    %cst = arith.constant dense<0.000000e+00> : vector<16x16xf32>
    %3 = tpu.matmul %0, %2, %cst {dimension_numbers = #tpu.dot_dimension_numbers<[1], [0], [0], [1], [0, 0, 1, 1], [], []>} : vector<16x32xf32>, vector<32x16xf32>, vector<16x16xf32> -> vector<16x16xf32>
    %c0_5 = arith.constant 0 : index
    %c0_6 = arith.constant 0 : index
    %4 = vector.load %arg6[%c0_5, %c0_6] : memref<32x16xf32, #tpu.memory_space<vmem>>, vector<32x16xf32>
    %cst_7 = arith.constant dense<0.000000e+00> : vector<16x16xf32>
    %5 = tpu.matmul %0, %4, %cst_7 {dimension_numbers = #tpu.dot_dimension_numbers<[1], [0], [0], [1], [0, 0, 1, 1], [], []>} : vector<16x32xf32>, vector<32x16xf32>, vector<16x16xf32> -> vector<16x16xf32>
    %c0_8 = arith.constant 0 : index
    %c0_9 = arith.constant 0 : index
    %6 = vector.load %arg7[%c0_8, %c0_9] : memref<32x32xf32, #tpu.memory_space<vmem>>, vector<32x32xf32>
    %cst_10 = arith.constant dense<0.000000e+00> : vector<16x32xf32>
    %7 = tpu.matmul %0, %6, %cst_10 {dimension_numbers = #tpu.dot_dimension_numbers<[1], [0], [0], [1], [0, 0, 1, 1], [], []>} : vector<16x32xf32>, vector<32x32xf32>, vector<16x32xf32> -> vector<16x32xf32>
    %c0_11 = arith.constant 0 : index
    %c0_12 = arith.constant 0 : index
    %8 = vector.load %arg8[%c0_11, %c0_12] : memref<8x4xf32, #tpu.memory_space<vmem>>, vector<8x4xf32>
    %cst_13 = arith.constant dense<0.000000e+00> : vector<48x4xf32>
    %9 = tpu.matmul %1, %8, %cst_13 {dimension_numbers = #tpu.dot_dimension_numbers<[1], [0], [0], [1], [0, 0, 1, 1], [], []>} : vector<48x8xf32>, vector<8x4xf32>, vector<48x4xf32> -> vector<48x4xf32>
    %c0_14 = arith.constant 0 : index
    %c0_15 = arith.constant 0 : index
    %10 = vector.load %arg9[%c0_14, %c0_15] : memref<1x4xf32, #tpu.memory_space<vmem>>, vector<1x4xf32>
    %11 = vector.broadcast %10 : vector<1x4xf32> to vector<48x4xf32>
    %12 = arith.addf %9, %11 : vector<48x4xf32>
    %cst_16 = arith.constant 0.000000e+00 : f32
    %13 = vector.broadcast %cst_16 : f32 to vector<48x4xf32>
    %14 = arith.maximumf %12, %13 : vector<48x4xf32>
    %15 = math.absf %12 : vector<48x4xf32>
    %cst_17 = arith.constant 0.000000e+00 : f32
    %16 = vector.broadcast %cst_17 : f32 to vector<48x4xf32>
    %17 = arith.subf %16, %15 : vector<48x4xf32>
    %18 = math.exp %17 : vector<48x4xf32>
    %cst_18 = arith.constant 1.000000e+00 : f32
    %19 = vector.broadcast %cst_18 : f32 to vector<48x4xf32>
    %20 = arith.addf %19, %18 : vector<48x4xf32>
    %21 = math.log %20 : vector<48x4xf32>
    %22 = arith.addf %14, %21 : vector<48x4xf32>
    %cst_19 = arith.constant 0.693147182 : f32
    %23 = vector.broadcast %cst_19 : f32 to vector<48x4xf32>
    %24 = arith.subf %22, %23 : vector<48x4xf32>
    %c0_20 = arith.constant 0 : index
    %c0_21 = arith.constant 0 : index
    %25 = vector.load %arg10[%c0_20, %c0_21] : memref<4x16xf32, #tpu.memory_space<vmem>>, vector<4x16xf32>
    %cst_22 = arith.constant dense<0.000000e+00> : vector<48x16xf32>
    %26 = tpu.matmul %24, %25, %cst_22 {dimension_numbers = #tpu.dot_dimension_numbers<[1], [0], [0], [1], [0, 0, 1, 1], [], []>} : vector<48x4xf32>, vector<4x16xf32>, vector<48x16xf32> -> vector<48x16xf32>
    %c0_23 = arith.constant 0 : index
    %c0_24 = arith.constant 0 : index
    %27 = vector.load %arg11[%c0_23, %c0_24] : memref<1x16xf32, #tpu.memory_space<vmem>>, vector<1x16xf32>
    %28 = vector.broadcast %27 : vector<1x16xf32> to vector<48x16xf32>
    %29 = arith.addf %26, %28 : vector<48x16xf32>
    %c0_25 = arith.constant 0 : index
    %c0_26 = arith.constant 0 : index
    %30 = vector.load %arg14[%c0_25, %c0_26] : memref<8x8xf32, #tpu.memory_space<vmem>>, vector<8x8xf32>
    %cst_27 = arith.constant dense<0.000000e+00> : vector<48x8xf32>
    %31 = tpu.matmul %1, %30, %cst_27 {dimension_numbers = #tpu.dot_dimension_numbers<[1], [0], [0], [1], [0, 0, 1, 1], [], []>} : vector<48x8xf32>, vector<8x8xf32>, vector<48x8xf32> -> vector<48x8xf32>
    %c0_28 = arith.constant 0 : index
    %c0_29 = arith.constant 0 : index
    %32 = vector.load %arg15[%c0_28, %c0_29] : memref<1x8xf32, #tpu.memory_space<vmem>>, vector<1x8xf32>
    %33 = vector.broadcast %32 : vector<1x8xf32> to vector<48x8xf32>
    %34 = arith.addf %31, %33 : vector<48x8xf32>
    %cst_30 = arith.constant 0.000000e+00 : f32
    %35 = vector.broadcast %cst_30 : f32 to vector<48x8xf32>
    %36 = arith.maximumf %34, %35 : vector<48x8xf32>
    %37 = math.absf %34 : vector<48x8xf32>
    %cst_31 = arith.constant 0.000000e+00 : f32
    %38 = vector.broadcast %cst_31 : f32 to vector<48x8xf32>
    %39 = arith.subf %38, %37 : vector<48x8xf32>
    %40 = math.exp %39 : vector<48x8xf32>
    %cst_32 = arith.constant 1.000000e+00 : f32
    %41 = vector.broadcast %cst_32 : f32 to vector<48x8xf32>
    %42 = arith.addf %41, %40 : vector<48x8xf32>
    %43 = math.log %42 : vector<48x8xf32>
    %44 = arith.addf %36, %43 : vector<48x8xf32>
    %cst_33 = arith.constant 0.693147182 : f32
    %45 = vector.broadcast %cst_33 : f32 to vector<48x8xf32>
    %46 = arith.subf %44, %45 : vector<48x8xf32>
    %c0_34 = arith.constant 0 : index
    %c0_35 = arith.constant 0 : index
    %47 = vector.load %arg16[%c0_34, %c0_35] : memref<8x32xf32, #tpu.memory_space<vmem>>, vector<8x32xf32>
    %cst_36 = arith.constant dense<0.000000e+00> : vector<48x32xf32>
    %48 = tpu.matmul %46, %47, %cst_36 {dimension_numbers = #tpu.dot_dimension_numbers<[1], [0], [0], [1], [0, 0, 1, 1], [], []>} : vector<48x8xf32>, vector<8x32xf32>, vector<48x32xf32> -> vector<48x32xf32>
    %c0_37 = arith.constant 0 : index
    %c0_38 = arith.constant 0 : index
    %49 = vector.load %arg17[%c0_37, %c0_38] : memref<1x32xf32, #tpu.memory_space<vmem>>, vector<1x32xf32>
    %50 = vector.broadcast %49 : vector<1x32xf32> to vector<48x32xf32>
    %51 = arith.addf %48, %50 : vector<48x32xf32>
    %c0_39 = arith.constant 0 : index
    %c0_40 = arith.constant 0 : index
    %52 = vector.load %arg4[%c0_39, %c0_40] : memref<48x1xi32, #tpu.memory_space<vmem>>, vector<48x1xi32>
    %53 = tpu.iota {dimensions = array<i32: 1>} : vector<48x16xi32>
    %54 = vector.broadcast %52 : vector<48x1xi32> to vector<48x16xi32>
    %55 = arith.cmpi eq, %54, %53 : vector<48x16xi32>
    %56 = arith.extui %55 : vector<48x16xi1> to vector<48x16xi32>
    %57 = arith.sitofp %56 : vector<48x16xi32> to vector<48x16xf32>
    %cst_41 = arith.constant dense<0.000000e+00> : vector<48x16xf32>
    %58 = tpu.matmul %57, %5, %cst_41 {dimension_numbers = #tpu.dot_dimension_numbers<[1], [0], [0], [1], [0, 0, 1, 1], [], []>} : vector<48x16xf32>, vector<16x16xf32>, vector<48x16xf32> -> vector<48x16xf32>
    %cst_42 = arith.constant dense<0.000000e+00> : vector<48x32xf32>
    %59 = tpu.matmul %57, %7, %cst_42 {dimension_numbers = #tpu.dot_dimension_numbers<[1], [0], [0], [1], [0, 0, 1, 1], [], []>} : vector<48x16xf32>, vector<16x32xf32>, vector<48x32xf32> -> vector<48x32xf32>
    %60 = arith.mulf %29, %58 : vector<48x16xf32>
    %c0_43 = arith.constant 0 : index
    %c0_44 = arith.constant 0 : index
    %61 = vector.load %arg12[%c0_43, %c0_44] : memref<16x16xf32, #tpu.memory_space<vmem>>, vector<16x16xf32>
    %cst_45 = arith.constant dense<0.000000e+00> : vector<48x16xf32>
    %62 = tpu.matmul %60, %61, %cst_45 {dimension_numbers = #tpu.dot_dimension_numbers<[1], [0], [0], [1], [0, 0, 1, 1], [], []>} : vector<48x16xf32>, vector<16x16xf32>, vector<48x16xf32> -> vector<48x16xf32>
    %c0_46 = arith.constant 0 : index
    %c0_47 = arith.constant 0 : index
    %63 = vector.load %arg13[%c0_46, %c0_47] : memref<1x16xf32, #tpu.memory_space<vmem>>, vector<1x16xf32>
    %64 = vector.broadcast %63 : vector<1x16xf32> to vector<48x16xf32>
    %65 = arith.addf %62, %64 : vector<48x16xf32>
    %66 = arith.mulf %51, %59 : vector<48x32xf32>
    %c0_48 = arith.constant 0 : index
    %c0_49 = arith.constant 0 : index
    %67 = vector.load %arg18[%c0_48, %c0_49] : memref<32x32xf32, #tpu.memory_space<vmem>>, vector<32x32xf32>
    %cst_50 = arith.constant dense<0.000000e+00> : vector<48x32xf32>
    %68 = tpu.matmul %66, %67, %cst_50 {dimension_numbers = #tpu.dot_dimension_numbers<[1], [0], [0], [1], [0, 0, 1, 1], [], []>} : vector<48x32xf32>, vector<32x32xf32>, vector<48x32xf32> -> vector<48x32xf32>
    %c0_51 = arith.constant 0 : index
    %c0_52 = arith.constant 0 : index
    %69 = vector.load %arg19[%c0_51, %c0_52] : memref<1x32xf32, #tpu.memory_space<vmem>>, vector<1x32xf32>
    %70 = vector.broadcast %69 : vector<1x32xf32> to vector<48x32xf32>
    %71 = arith.addf %68, %70 : vector<48x32xf32>
    %c0_53 = arith.constant 0 : index
    %c0_54 = arith.constant 0 : index
    %72 = vector.load %arg3[%c0_53, %c0_54] : memref<1x48xi32, #tpu.memory_space<vmem>>, vector<1x48xi32>
    %73 = tpu.iota {dimensions = array<i32: 0>} : vector<16x48xi32>
    %74 = vector.broadcast %72 : vector<1x48xi32> to vector<16x48xi32>
    %75 = arith.cmpi eq, %74, %73 : vector<16x48xi32>
    %76 = arith.extui %75 : vector<16x48xi1> to vector<16x48xi32>
    %77 = arith.sitofp %76 : vector<16x48xi32> to vector<16x48xf32>
    %cst_55 = arith.constant 0.000000e+00 : f32
    %cst_56 = arith.constant -1.000000e+09 : f32
    %78 = vector.broadcast %cst_55 : f32 to vector<16x48xf32>
    %79 = vector.broadcast %cst_56 : f32 to vector<16x48xf32>
    %80 = arith.select %75, %78, %79 : vector<16x48xi1>, vector<16x48xf32>
    %81 = vector.extract_strided_slice %3 {offsets = [0, 0], sizes = [16, 4], strides = [1, 1]} : vector<16x16xf32> to vector<16x4xf32>
    %82 = vector.extract_strided_slice %65 {offsets = [0, 0], sizes = [48, 4], strides = [1, 1]} : vector<48x16xf32> to vector<48x4xf32>
    %cst_57 = arith.constant dense<0.000000e+00> : vector<16x48xf32>
    %83 = tpu.matmul %81, %82, %cst_57 {dimension_numbers = #tpu.dot_dimension_numbers<[1], [1], [0], [0], [0, 0, 1, 0], [], []>} : vector<16x4xf32>, vector<48x4xf32>, vector<16x48xf32> -> vector<16x48xf32>
    %cst_58 = arith.constant 5.000000e-01 : f32
    %84 = vector.broadcast %cst_58 : f32 to vector<16x48xf32>
    %85 = arith.mulf %83, %84 : vector<16x48xf32>
    %86 = arith.addf %85, %80 : vector<16x48xf32>
    %cst_59 = arith.constant dense<0xFF800000> : vector<16xf32>
    %87 = vector.multi_reduction <maximumf>, %86, %cst_59 [1] : vector<16x48xf32> to vector<16xf32>
    %88 = vector.shape_cast %87 : vector<16xf32> to vector<16x1xf32>
    %89 = vector.broadcast %88 : vector<16x1xf32> to vector<16x48xf32>
    %90 = arith.subf %86, %89 : vector<16x48xf32>
    %91 = math.exp %90 : vector<16x48xf32>
    %92 = arith.mulf %91, %77 : vector<16x48xf32>
    %cst_60 = arith.constant dense<0.000000e+00> : vector<16xf32>
    %93 = vector.multi_reduction <add>, %92, %cst_60 [1] : vector<16x48xf32> to vector<16xf32>
    %94 = vector.shape_cast %93 : vector<16xf32> to vector<16x1xf32>
    %cst_61 = arith.constant 0.000000e+00 : f32
    %95 = vector.broadcast %cst_61 : f32 to vector<16x1xf32>
    %96 = arith.cmpf ogt, %94, %95 : vector<16x1xf32>
    %cst_62 = arith.constant 1.000000e+00 : f32
    %97 = vector.broadcast %cst_62 : f32 to vector<16x1xf32>
    %98 = arith.select %96, %94, %97 : vector<16x1xi1>, vector<16x1xf32>
    %cst_63 = arith.constant 1.000000e+00 : f32
    %99 = vector.broadcast %cst_63 : f32 to vector<16x1xf32>
    %100 = arith.divf %99, %98 : vector<16x1xf32>
    %101 = vector.broadcast %100 : vector<16x1xf32> to vector<16x48xf32>
    %102 = arith.mulf %92, %101 : vector<16x48xf32>
    %103 = vector.extract_strided_slice %71 {offsets = [0, 0], sizes = [48, 8], strides = [1, 1]} : vector<48x32xf32> to vector<48x8xf32>
    %cst_64 = arith.constant dense<0.000000e+00> : vector<16x8xf32>
    %104 = tpu.matmul %102, %103, %cst_64 {dimension_numbers = #tpu.dot_dimension_numbers<[1], [0], [0], [1], [0, 0, 1, 1], [], []>} : vector<16x48xf32>, vector<48x8xf32>, vector<16x8xf32> -> vector<16x8xf32>
    %c0_65 = arith.constant 0 : index
    %c0_66 = arith.constant 0 : index
    %105 = vector.load %arg27[%c0_65, %c0_66] : memref<16x32xf32, #tpu.memory_space<vmem>>, vector<16x8xf32>
    tpu.vector_store %arg27[%c0_65, %c0_66], %104 {strides = array<i32>} : memref<16x32xf32, #tpu.memory_space<vmem>>, vector<16x8xf32>,
    %106 = vector.extract_strided_slice %3 {offsets = [0, 4], sizes = [16, 4], strides = [1, 1]} : vector<16x16xf32> to vector<16x4xf32>
    %107 = vector.extract_strided_slice %65 {offsets = [0, 4], sizes = [48, 4], strides = [1, 1]} : vector<48x16xf32> to vector<48x4xf32>
    %cst_67 = arith.constant dense<0.000000e+00> : vector<16x48xf32>
    %108 = tpu.matmul %106, %107, %cst_67 {dimension_numbers = #tpu.dot_dimension_numbers<[1], [1], [0], [0], [0, 0, 1, 0], [], []>} : vector<16x4xf32>, vector<48x4xf32>, vector<16x48xf32> -> vector<16x48xf32>
    %cst_68 = arith.constant 5.000000e-01 : f32
    %109 = vector.broadcast %cst_68 : f32 to vector<16x48xf32>
    %110 = arith.mulf %108, %109 : vector<16x48xf32>
    %111 = arith.addf %110, %80 : vector<16x48xf32>
    %cst_69 = arith.constant dense<0xFF800000> : vector<16xf32>
    %112 = vector.multi_reduction <maximumf>, %111, %cst_69 [1] : vector<16x48xf32> to vector<16xf32>
    %113 = vector.shape_cast %112 : vector<16xf32> to vector<16x1xf32>
    %114 = vector.broadcast %113 : vector<16x1xf32> to vector<16x48xf32>
    %115 = arith.subf %111, %114 : vector<16x48xf32>
    %116 = math.exp %115 : vector<16x48xf32>
    %117 = arith.mulf %116, %77 : vector<16x48xf32>
    %cst_70 = arith.constant dense<0.000000e+00> : vector<16xf32>
    %118 = vector.multi_reduction <add>, %117, %cst_70 [1] : vector<16x48xf32> to vector<16xf32>
    %119 = vector.shape_cast %118 : vector<16xf32> to vector<16x1xf32>
    %cst_71 = arith.constant 0.000000e+00 : f32
    %120 = vector.broadcast %cst_71 : f32 to vector<16x1xf32>
    %121 = arith.cmpf ogt, %119, %120 : vector<16x1xf32>
    %cst_72 = arith.constant 1.000000e+00 : f32
    %122 = vector.broadcast %cst_72 : f32 to vector<16x1xf32>
    %123 = arith.select %121, %119, %122 : vector<16x1xi1>, vector<16x1xf32>
    %cst_73 = arith.constant 1.000000e+00 : f32
    %124 = vector.broadcast %cst_73 : f32 to vector<16x1xf32>
    %125 = arith.divf %124, %123 : vector<16x1xf32>
    %126 = vector.broadcast %125 : vector<16x1xf32> to vector<16x48xf32>
    %127 = arith.mulf %117, %126 : vector<16x48xf32>
    %128 = vector.extract_strided_slice %71 {offsets = [0, 8], sizes = [48, 8], strides = [1, 1]} : vector<48x32xf32> to vector<48x8xf32>
    %cst_74 = arith.constant dense<0.000000e+00> : vector<16x8xf32>
    %129 = tpu.matmul %127, %128, %cst_74 {dimension_numbers = #tpu.dot_dimension_numbers<[1], [0], [0], [1], [0, 0, 1, 1], [], []>} : vector<16x48xf32>, vector<48x8xf32>, vector<16x8xf32> -> vector<16x8xf32>
    %c0_75 = arith.constant 0 : index
    %c8 = arith.constant 8 : index
    %130 = vector.load %arg27[%c0_75, %c8] : memref<16x32xf32, #tpu.memory_space<vmem>>, vector<16x8xf32>
    tpu.vector_store %arg27[%c0_75, %c8], %129 {strides = array<i32>} : memref<16x32xf32, #tpu.memory_space<vmem>>, vector<16x8xf32>,
    %131 = vector.extract_strided_slice %3 {offsets = [0, 8], sizes = [16, 4], strides = [1, 1]} : vector<16x16xf32> to vector<16x4xf32>
    %132 = vector.extract_strided_slice %65 {offsets = [0, 8], sizes = [48, 4], strides = [1, 1]} : vector<48x16xf32> to vector<48x4xf32>
    %cst_76 = arith.constant dense<0.000000e+00> : vector<16x48xf32>
    %133 = tpu.matmul %131, %132, %cst_76 {dimension_numbers = #tpu.dot_dimension_numbers<[1], [1], [0], [0], [0, 0, 1, 0], [], []>} : vector<16x4xf32>, vector<48x4xf32>, vector<16x48xf32> -> vector<16x48xf32>
    %cst_77 = arith.constant 5.000000e-01 : f32
    %134 = vector.broadcast %cst_77 : f32 to vector<16x48xf32>
    %135 = arith.mulf %133, %134 : vector<16x48xf32>
    %136 = arith.addf %135, %80 : vector<16x48xf32>
    %cst_78 = arith.constant dense<0xFF800000> : vector<16xf32>
    %137 = vector.multi_reduction <maximumf>, %136, %cst_78 [1] : vector<16x48xf32> to vector<16xf32>
    %138 = vector.shape_cast %137 : vector<16xf32> to vector<16x1xf32>
    %139 = vector.broadcast %138 : vector<16x1xf32> to vector<16x48xf32>
    %140 = arith.subf %136, %139 : vector<16x48xf32>
    %141 = math.exp %140 : vector<16x48xf32>
    %142 = arith.mulf %141, %77 : vector<16x48xf32>
    %cst_79 = arith.constant dense<0.000000e+00> : vector<16xf32>
    %143 = vector.multi_reduction <add>, %142, %cst_79 [1] : vector<16x48xf32> to vector<16xf32>
    %144 = vector.shape_cast %143 : vector<16xf32> to vector<16x1xf32>
    %cst_80 = arith.constant 0.000000e+00 : f32
    %145 = vector.broadcast %cst_80 : f32 to vector<16x1xf32>
    %146 = arith.cmpf ogt, %144, %145 : vector<16x1xf32>
    %cst_81 = arith.constant 1.000000e+00 : f32
    %147 = vector.broadcast %cst_81 : f32 to vector<16x1xf32>
    %148 = arith.select %146, %144, %147 : vector<16x1xi1>, vector<16x1xf32>
    %cst_82 = arith.constant 1.000000e+00 : f32
    %149 = vector.broadcast %cst_82 : f32 to vector<16x1xf32>
    %150 = arith.divf %149, %148 : vector<16x1xf32>
    %151 = vector.broadcast %150 : vector<16x1xf32> to vector<16x48xf32>
    %152 = arith.mulf %142, %151 : vector<16x48xf32>
    %153 = vector.extract_strided_slice %71 {offsets = [0, 16], sizes = [48, 8], strides = [1, 1]} : vector<48x32xf32> to vector<48x8xf32>
    %cst_83 = arith.constant dense<0.000000e+00> : vector<16x8xf32>
    %154 = tpu.matmul %152, %153, %cst_83 {dimension_numbers = #tpu.dot_dimension_numbers<[1], [0], [0], [1], [0, 0, 1, 1], [], []>} : vector<16x48xf32>, vector<48x8xf32>, vector<16x8xf32> -> vector<16x8xf32>
    %c0_84 = arith.constant 0 : index
    %c16 = arith.constant 16 : index
    %155 = vector.load %arg27[%c0_84, %c16] : memref<16x32xf32, #tpu.memory_space<vmem>>, vector<16x8xf32>
    tpu.vector_store %arg27[%c0_84, %c16], %154 {strides = array<i32>} : memref<16x32xf32, #tpu.memory_space<vmem>>, vector<16x8xf32>,
    %156 = vector.extract_strided_slice %3 {offsets = [0, 12], sizes = [16, 4], strides = [1, 1]} : vector<16x16xf32> to vector<16x4xf32>
    %157 = vector.extract_strided_slice %65 {offsets = [0, 12], sizes = [48, 4], strides = [1, 1]} : vector<48x16xf32> to vector<48x4xf32>
    %cst_85 = arith.constant dense<0.000000e+00> : vector<16x48xf32>
    %158 = tpu.matmul %156, %157, %cst_85 {dimension_numbers = #tpu.dot_dimension_numbers<[1], [1], [0], [0], [0, 0, 1, 0], [], []>} : vector<16x4xf32>, vector<48x4xf32>, vector<16x48xf32> -> vector<16x48xf32>
    %cst_86 = arith.constant 5.000000e-01 : f32
    %159 = vector.broadcast %cst_86 : f32 to vector<16x48xf32>
    %160 = arith.mulf %158, %159 : vector<16x48xf32>
    %161 = arith.addf %160, %80 : vector<16x48xf32>
    %cst_87 = arith.constant dense<0xFF800000> : vector<16xf32>
    %162 = vector.multi_reduction <maximumf>, %161, %cst_87 [1] : vector<16x48xf32> to vector<16xf32>
    %163 = vector.shape_cast %162 : vector<16xf32> to vector<16x1xf32>
    %164 = vector.broadcast %163 : vector<16x1xf32> to vector<16x48xf32>
    %165 = arith.subf %161, %164 : vector<16x48xf32>
    %166 = math.exp %165 : vector<16x48xf32>
    %167 = arith.mulf %166, %77 : vector<16x48xf32>
    %cst_88 = arith.constant dense<0.000000e+00> : vector<16xf32>
    %168 = vector.multi_reduction <add>, %167, %cst_88 [1] : vector<16x48xf32> to vector<16xf32>
    %169 = vector.shape_cast %168 : vector<16xf32> to vector<16x1xf32>
    %cst_89 = arith.constant 0.000000e+00 : f32
    %170 = vector.broadcast %cst_89 : f32 to vector<16x1xf32>
    %171 = arith.cmpf ogt, %169, %170 : vector<16x1xf32>
    %cst_90 = arith.constant 1.000000e+00 : f32
    %172 = vector.broadcast %cst_90 : f32 to vector<16x1xf32>
    %173 = arith.select %171, %169, %172 : vector<16x1xi1>, vector<16x1xf32>
    %cst_91 = arith.constant 1.000000e+00 : f32
    %174 = vector.broadcast %cst_91 : f32 to vector<16x1xf32>
    %175 = arith.divf %174, %173 : vector<16x1xf32>
    %176 = vector.broadcast %175 : vector<16x1xf32> to vector<16x48xf32>
    %177 = arith.mulf %167, %176 : vector<16x48xf32>
    %178 = vector.extract_strided_slice %71 {offsets = [0, 24], sizes = [48, 8], strides = [1, 1]} : vector<48x32xf32> to vector<48x8xf32>
    %cst_92 = arith.constant dense<0.000000e+00> : vector<16x8xf32>
    %179 = tpu.matmul %177, %178, %cst_92 {dimension_numbers = #tpu.dot_dimension_numbers<[1], [0], [0], [1], [0, 0, 1, 1], [], []>} : vector<16x48xf32>, vector<48x8xf32>, vector<16x8xf32> -> vector<16x8xf32>
    %c0_93 = arith.constant 0 : index
    %c24 = arith.constant 24 : index
    %180 = vector.load %arg27[%c0_93, %c24] : memref<16x32xf32, #tpu.memory_space<vmem>>, vector<16x8xf32>
    tpu.vector_store %arg27[%c0_93, %c24], %179 {strides = array<i32>} : memref<16x32xf32, #tpu.memory_space<vmem>>, vector<16x8xf32>,
    %c0_94 = arith.constant 0 : index
    %c0_95 = arith.constant 0 : index
    %181 = vector.load %arg27[%c0_94, %c0_95] : memref<16x32xf32, #tpu.memory_space<vmem>>, vector<16x32xf32>
    %c0_96 = arith.constant 0 : index
    %c0_97 = arith.constant 0 : index
    %182 = vector.load %arg20[%c0_96, %c0_97] : memref<32x32xf32, #tpu.memory_space<vmem>>, vector<32x32xf32>
    %cst_98 = arith.constant dense<0.000000e+00> : vector<16x32xf32>
    %183 = tpu.matmul %0, %182, %cst_98 {dimension_numbers = #tpu.dot_dimension_numbers<[1], [0], [0], [1], [0, 0, 1, 1], [], []>} : vector<16x32xf32>, vector<32x32xf32>, vector<16x32xf32> -> vector<16x32xf32>
    %c0_99 = arith.constant 0 : index
    %c0_100 = arith.constant 0 : index
    %184 = vector.load %arg21[%c0_99, %c0_100] : memref<1x32xf32, #tpu.memory_space<vmem>>, vector<1x32xf32>
    %185 = vector.broadcast %184 : vector<1x32xf32> to vector<16x32xf32>
    %186 = arith.addf %183, %185 : vector<16x32xf32>
    %187 = arith.addf %186, %181 : vector<16x32xf32>
    %cst_101 = arith.constant 0.000000e+00 : f32
    %188 = vector.broadcast %cst_101 : f32 to vector<16x32xf32>
    %189 = arith.maximumf %187, %188 : vector<16x32xf32>
    %190 = math.absf %187 : vector<16x32xf32>
    %cst_102 = arith.constant 0.000000e+00 : f32
    %191 = vector.broadcast %cst_102 : f32 to vector<16x32xf32>
    %192 = arith.subf %191, %190 : vector<16x32xf32>
    %193 = math.exp %192 : vector<16x32xf32>
    %cst_103 = arith.constant 1.000000e+00 : f32
    %194 = vector.broadcast %cst_103 : f32 to vector<16x32xf32>
    %195 = arith.addf %194, %193 : vector<16x32xf32>
    %196 = math.log %195 : vector<16x32xf32>
    %197 = arith.addf %189, %196 : vector<16x32xf32>
    %cst_104 = arith.constant 0.693147182 : f32
    %198 = vector.broadcast %cst_104 : f32 to vector<16x32xf32>
    %199 = arith.subf %197, %198 : vector<16x32xf32>
    %c0_105 = arith.constant 0 : index
    %c0_106 = arith.constant 0 : index
    %200 = vector.load %arg22[%c0_105, %c0_106] : memref<32x32xf32, #tpu.memory_space<vmem>>, vector<32x32xf32>
    %cst_107 = arith.constant dense<0.000000e+00> : vector<16x32xf32>
    %201 = tpu.matmul %199, %200, %cst_107 {dimension_numbers = #tpu.dot_dimension_numbers<[1], [0], [0], [1], [0, 0, 1, 1], [], []>} : vector<16x32xf32>, vector<32x32xf32>, vector<16x32xf32> -> vector<16x32xf32>
    %c0_108 = arith.constant 0 : index
    %c0_109 = arith.constant 0 : index
    %202 = vector.load %arg23[%c0_108, %c0_109] : memref<1x32xf32, #tpu.memory_space<vmem>>, vector<1x32xf32>
    %203 = vector.broadcast %202 : vector<1x32xf32> to vector<16x32xf32>
    %204 = arith.addf %201, %203 : vector<16x32xf32>
    %cst_110 = arith.constant dense<0.000000e+00> : vector<16xf32>
    %205 = vector.multi_reduction <add>, %204, %cst_110 [1] : vector<16x32xf32> to vector<16xf32>
    %206 = vector.shape_cast %205 : vector<16xf32> to vector<16x1xf32>
    %cst_111 = arith.constant 3.200000e+01 : f32
    %207 = vector.broadcast %cst_111 : f32 to vector<16x1xf32>
    %208 = arith.divf %206, %207 : vector<16x1xf32>
    %209 = vector.broadcast %208 : vector<16x1xf32> to vector<16x32xf32>
    %210 = arith.subf %204, %209 : vector<16x32xf32>
    %211 = arith.mulf %210, %210 : vector<16x32xf32>
    %cst_112 = arith.constant dense<0.000000e+00> : vector<16xf32>
    %212 = vector.multi_reduction <add>, %211, %cst_112 [1] : vector<16x32xf32> to vector<16xf32>
    %213 = vector.shape_cast %212 : vector<16xf32> to vector<16x1xf32>
    %cst_113 = arith.constant 3.200000e+01 : f32
    %214 = vector.broadcast %cst_113 : f32 to vector<16x1xf32>
    %215 = arith.divf %213, %214 : vector<16x1xf32>
    %216 = vector.broadcast %208 : vector<16x1xf32> to vector<16x32xf32>
    %217 = arith.subf %204, %216 : vector<16x32xf32>
    %cst_114 = arith.constant 9.99999974E-6 : f32
    %218 = vector.broadcast %cst_114 : f32 to vector<16x1xf32>
    %219 = arith.addf %215, %218 : vector<16x1xf32>
    %220 = math.rsqrt %219 : vector<16x1xf32>
    %221 = vector.broadcast %220 : vector<16x1xf32> to vector<16x32xf32>
    %222 = arith.mulf %217, %221 : vector<16x32xf32>
    %c0_115 = arith.constant 0 : index
    %c0_116 = arith.constant 0 : index
    %223 = vector.load %arg24[%c0_115, %c0_116] : memref<1x32xf32, #tpu.memory_space<vmem>>, vector<1x32xf32>
    %224 = vector.broadcast %223 : vector<1x32xf32> to vector<16x32xf32>
    %225 = arith.mulf %222, %224 : vector<16x32xf32>
    %c0_117 = arith.constant 0 : index
    %c0_118 = arith.constant 0 : index
    %226 = vector.load %arg25[%c0_117, %c0_118] : memref<1x32xf32, #tpu.memory_space<vmem>>, vector<1x32xf32>
    %227 = vector.broadcast %226 : vector<1x32xf32> to vector<16x32xf32>
    %228 = arith.addf %225, %227 : vector<16x32xf32>
    %c0_119 = arith.constant 0 : index
    %c0_120 = arith.constant 0 : index
    %229 = vector.load %arg26[%c0_119, %c0_120] : memref<16x32xf32, #tpu.memory_space<vmem>>, vector<16x32xf32>
    tpu.vector_store %arg26[%c0_119, %c0_120], %228 {strides = array<i32>} : memref<16x32xf32, #tpu.memory_space<vmem>>, vector<16x32xf32>,
    return
  }
  func.func @transform_0(%arg0: i32) -> (i32, i32) {
    %c0_i32 = arith.constant 0 : i32
    %c0_i32_0 = arith.constant 0 : i32
    %c0_i32_1 = arith.constant 0 : i32
    return %c0_i32, %c0_i32_0 : i32, i32
  }
  func.func @transform_1(%arg0: i32) -> (i32, i32) {
    %c0_i32 = arith.constant 0 : i32
    %c0_i32_0 = arith.constant 0 : i32
    %c0_i32_1 = arith.constant 0 : i32
    return %c0_i32, %c0_i32_0 : i32, i32
  }
  func.func @transform_2(%arg0: i32) -> (i32, i32) {
    %c0_i32 = arith.constant 0 : i32
    %c0_i32_0 = arith.constant 0 : i32
    %c0_i32_1 = arith.constant 0 : i32
    return %c0_i32, %c0_i32_0 : i32, i32
  }
  func.func @transform_3(%arg0: i32) -> (i32, i32) {
    %c0_i32 = arith.constant 0 : i32
    %c0_i32_0 = arith.constant 0 : i32
    %c0_i32_1 = arith.constant 0 : i32
    return %c0_i32, %c0_i32_0 : i32, i32
  }
  func.func @transform_4(%arg0: i32) -> (i32, i32) {
    %c0_i32 = arith.constant 0 : i32
    %c0_i32_0 = arith.constant 0 : i32
    %c0_i32_1 = arith.constant 0 : i32
    return %c0_i32, %c0_i32_0 : i32, i32
  }
  func.func @transform_5(%arg0: i32) -> (i32, i32) {
    %c0_i32 = arith.constant 0 : i32
    %c0_i32_0 = arith.constant 0 : i32
    %c0_i32_1 = arith.constant 0 : i32
    return %c0_i32, %c0_i32_0 : i32, i32
  }
  func.func @transform_6(%arg0: i32) -> (i32, i32) {
    %c0_i32 = arith.constant 0 : i32
    %c0_i32_0 = arith.constant 0 : i32
    %c0_i32_1 = arith.constant 0 : i32
    return %c0_i32, %c0_i32_0 : i32, i32
  }
  func.func @transform_7(%arg0: i32) -> (i32, i32) {
    %c0_i32 = arith.constant 0 : i32
    %c0_i32_0 = arith.constant 0 : i32
    %c0_i32_1 = arith.constant 0 : i32
    return %c0_i32, %c0_i32_0 : i32, i32
  }
  func.func @transform_8(%arg0: i32) -> (i32, i32) {
    %c0_i32 = arith.constant 0 : i32
    %c0_i32_0 = arith.constant 0 : i32
    %c0_i32_1 = arith.constant 0 : i32
    return %c0_i32, %c0_i32_0 : i32, i32
  }
  func.func @transform_9(%arg0: i32) -> (i32, i32) {
    %c0_i32 = arith.constant 0 : i32
    %c0_i32_0 = arith.constant 0 : i32
    %c0_i32_1 = arith.constant 0 : i32
    return %c0_i32, %c0_i32_0 : i32, i32
  }
  func.func @transform_10(%arg0: i32) -> (i32, i32) {
    %c0_i32 = arith.constant 0 : i32
    %c0_i32_0 = arith.constant 0 : i32
    %c0_i32_1 = arith.constant 0 : i32
    return %c0_i32, %c0_i32_0 : i32, i32
  }
  func.func @transform_11(%arg0: i32) -> (i32, i32) {
    %c0_i32 = arith.constant 0 : i32
    %c0_i32_0 = arith.constant 0 : i32
    %c0_i32_1 = arith.constant 0 : i32
    return %c0_i32, %c0_i32_0 : i32, i32
  }
  func.func @transform_12(%arg0: i32) -> (i32, i32) {
    %c0_i32 = arith.constant 0 : i32
    %c0_i32_0 = arith.constant 0 : i32
    %c0_i32_1 = arith.constant 0 : i32
    return %c0_i32, %c0_i32_0 : i32, i32
  }
  func.func @transform_13(%arg0: i32) -> (i32, i32) {
    %c0_i32 = arith.constant 0 : i32
    %c0_i32_0 = arith.constant 0 : i32
    %c0_i32_1 = arith.constant 0 : i32
    return %c0_i32, %c0_i32_0 : i32, i32
  }
  func.func @transform_14(%arg0: i32) -> (i32, i32) {
    %c0_i32 = arith.constant 0 : i32
    %c0_i32_0 = arith.constant 0 : i32
    %c0_i32_1 = arith.constant 0 : i32
    return %c0_i32, %c0_i32_0 : i32, i32
  }
  func.func @transform_15(%arg0: i32) -> (i32, i32) {
    %c0_i32 = arith.constant 0 : i32
    %c0_i32_0 = arith.constant 0 : i32
    %c0_i32_1 = arith.constant 0 : i32
    return %c0_i32, %c0_i32_0 : i32, i32
  }
  func.func @transform_16(%arg0: i32) -> (i32, i32) {
    %c0_i32 = arith.constant 0 : i32
    %c0_i32_0 = arith.constant 0 : i32
    %c0_i32_1 = arith.constant 0 : i32
    return %c0_i32, %c0_i32_0 : i32, i32
  }
  func.func @transform_17(%arg0: i32) -> (i32, i32) {
    %c0_i32 = arith.constant 0 : i32
    %c0_i32_0 = arith.constant 0 : i32
    %c0_i32_1 = arith.constant 0 : i32
    return %c0_i32, %c0_i32_0 : i32, i32
  }
  func.func @transform_18(%arg0: i32) -> (i32, i32) {
    %c0_i32 = arith.constant 0 : i32
    %c0_i32_0 = arith.constant 0 : i32
    %c0_i32_1 = arith.constant 0 : i32
    return %c0_i32, %c0_i32_0 : i32, i32
  }
  func.func @transform_19(%arg0: i32) -> (i32, i32) {
    %c0_i32 = arith.constant 0 : i32
    %c0_i32_0 = arith.constant 0 : i32
    %c0_i32_1 = arith.constant 0 : i32
    return %c0_i32, %c0_i32_0 : i32, i32
  }
  func.func @transform_20(%arg0: i32) -> (i32, i32) {
    %c0_i32 = arith.constant 0 : i32
    %c0_i32_0 = arith.constant 0 : i32
    %c0_i32_1 = arith.constant 0 : i32
    return %c0_i32, %c0_i32_0 : i32, i32
  }
  func.func @transform_21(%arg0: i32) -> (i32, i32) {
    %c0_i32 = arith.constant 0 : i32
    %c0_i32_0 = arith.constant 0 : i32
    %c0_i32_1 = arith.constant 0 : i32
    return %c0_i32, %c0_i32_0 : i32, i32
  }
  func.func @transform_22(%arg0: i32) -> (i32, i32) {
    %c0_i32 = arith.constant 0 : i32
    %c0_i32_0 = arith.constant 0 : i32
    %c0_i32_1 = arith.constant 0 : i32
    return %c0_i32, %c0_i32_0 : i32, i32
  }
  func.func @transform_23(%arg0: i32) -> (i32, i32) {
    %c0_i32 = arith.constant 0 : i32
    %c0_i32_0 = arith.constant 0 : i32
    %c0_i32_1 = arith.constant 0 : i32
    return %c0_i32, %c0_i32_0 : i32, i32
  }
  func.func @transform_24(%arg0: i32) -> (i32, i32) {
    %c0_i32 = arith.constant 0 : i32
    %c0_i32_0 = arith.constant 0 : i32
    %c0_i32_1 = arith.constant 0 : i32
    return %c0_i32, %c0_i32_0 : i32, i32
  }
  func.func @transform_25(%arg0: i32) -> (i32, i32) {
    %c0_i32 = arith.constant 0 : i32
    %c0_i32_0 = arith.constant 0 : i32
    %c0_i32_1 = arith.constant 0 : i32
    return %c0_i32, %c0_i32_0 : i32, i32
  }
}

</mosaic_0001>

<bundles_post_ra>
// kernel: tpu_custom_call.1
= control target key start
LH: loop header
LB: loop body
LE: loop exit
PB: predicated region body
PF: predicated region fallthrough
CT: control target
= control target key end

     0   :  { %s4352_s0 = inlined_call_operand.vmem [shape: f32[16,32], index: 0, kind: input, shape index: {}]   ;;  %s4353_s1 = inlined_call_operand.vmem [shape: f32[48,8], index: 1, kind: input, shape index: {}]   ;;  %s4354_s2 = inlined_call_operand.vmem [shape: s32[1,48], index: 2, kind: input, shape index: {}]   ;;  %s4355_s3 = inlined_call_operand.vmem [shape: s32[48,1], index: 3, kind: input, shape index: {}]   ;;  %s4356_s4 = inlined_call_operand.vmem [shape: f32[32,16], index: 4, kind: input, shape index: {}]   ;;  %s4357_s5 = inlined_call_operand.vmem [shape: f32[32,16], index: 5, kind: input, shape index: {}]   ;;  %s4358_s6 = inlined_call_operand.vmem [shape: f32[32,32], index: 6, kind: input, shape index: {}]   ;;  %s4359_s7 = inlined_call_operand.vmem [shape: f32[8,4], index: 7, kind: input, shape index: {}]   ;;  %s4360_s8 = inlined_call_operand.vmem [shape: f32[1,4], index: 8, kind: input, shape index: {}]   ;;  %s4361_s9 = inlined_call_operand.vmem [shape: f32[4,16], index: 9, kind: input, shape index: {}]   ;;  %s4362_s10 = inlined_call_operand.vmem [shape: f32[1,16], index: 10, kind: input, shape index: {}]   ;;  %s4363_s11 = inlined_call_operand.vmem [shape: f32[16,16], index: 11, kind: input, shape index: {}]   ;;  %s4364_s12 = inlined_call_operand.vmem [shape: f32[1,16], index: 12, kind: input, shape index: {}]   ;;  %s4365_s13 = inlined_call_operand.vmem [shape: f32[8,8], index: 13, kind: input, shape index: {}]   ;;  %s4366_s14 = inlined_call_operand.vmem [shape: f32[1,8], index: 14, kind: input, shape index: {}]   ;;  %s4367_s15 = inlined_call_operand.vmem [shape: f32[8,32], index: 15, kind: input, shape index: {}]   ;;  %s4368_s16 = inlined_call_operand.vmem [shape: f32[1,32], index: 16, kind: input, shape index: {}]   ;;  %s4369_s17 = inlined_call_operand.vmem [shape: f32[32,32], index: 17, kind: input, shape index: {}]   ;;  %s4370_s18 = inlined_call_operand.vmem [shape: f32[1,32], index: 18, kind: input, shape index: {}]   ;;  %s4371_s19 = inlined_call_operand.vmem [shape: f32[32,32], index: 19, kind: input, shape index: {}]   ;;  %s4372_s20 = inlined_call_operand.vmem [shape: f32[1,32], index: 20, kind: input, shape index: {}]   ;;  %s4373_s21 = inlined_call_operand.vmem [shape: f32[32,32], index: 21, kind: input, shape index: {}]   ;;  %s4374_s22 = inlined_call_operand.vmem [shape: f32[1,32], index: 22, kind: input, shape index: {}]   ;;  %s4375_s23 = inlined_call_operand.vmem [shape: f32[1,32], index: 23, kind: input, shape index: {}]   ;;  %s4376_s24 = inlined_call_operand.vmem [shape: f32[1,32], index: 24, kind: input, shape index: {}]   ;;  %s4377_s25 = inlined_call_operand.hbm [shape: f32[16,32], index: 25, kind: output, shape index: {}]  }
   0x1   :  { %4384 = sst [smem:[#allocation6_spill]] %s4352_s0 }
   0x2   :  { %4385 = sst [smem:[#allocation7_spill]] %s4353_s1 }
   0x3   :  { %4386 = sst [smem:[#allocation8_spill]] %s4354_s2 }
   0x4   :  { %4387 = sst [smem:[#allocation9_spill]] %s4355_s3 }
   0x5   :  { %4388 = sst [smem:[#allocation10_spill]] %s4356_s4 }
   0x6   :  { %4389 = sst [smem:[#allocation11_spill]] %s4357_s5 }
   0x7   :  { %4390 = sst [smem:[#allocation12_spill]] %s4358_s6 }
   0x8   :  { %4391 = sst [smem:[#allocation13_spill]] %s4359_s7 }
   0x9   :  { %4392 = sst [smem:[#allocation14_spill]] %s4360_s8 }
   0xa   :  { %4393 = sst [smem:[#allocation15_spill]] %s4361_s9 }
   0xb   :  { %s4394_s6 = sld [smem:[#allocation11_spill]]  ;;  %vm93_vm0 = vcmask 261120   ;;  %s4395_s28 = sld [smem:[#allocation6_spill]]  ;;  %v3661_v6 = vmov 0  }
   0xc   :  { %3451 = vset.pattern.permute.xlu0 %v3661_v6  ;;  %3452 = vset.pattern.permute.xlu1 %v3661_v6  ;;  %s4396_s0 = sld [smem:[#allocation9_spill]]  ;;  %s4397_s7 = sld [smem:[#allocation13_spill]] }
  0x11   :  { %v175_v0 = vld [vmem:[%s4394_s6] sm:$0xff]  ;;  %v176_v1 = vld [vmem:[%s4394_s6 + $0x8] sm:$0xff]  ;;  %v177_v2 = vld [vmem:[%s4394_s6 + $0x10] sm:$0xff] }
  0x12   :  { %v3264_v3 = vpack.c.bf16 %v176_v1, %v175_v0  ;;  %v178_v4 = vld [vmem:[%s4394_s6 + $0x18] sm:$0xff]  ;;  %v81_v5 = vld [vmem:[%s4395_s28] sm:$0xff]  ;;  %v927_v9 = vld [vmem:[%s4396_s0 + $0x10] sm:$0xff] }
  0x13   :  { %v3268_v7 = vpack.c.bf16 %v178_v4, %v177_v2  ;;  %3000 = vmatprep.mubr.msk.f32.mxu1 %vm93_vm0, %v81_v5  ;;  %2989 = vmatprep.mubr.msk.f32.mxu0 %vm93_vm0, %v81_v5  ;;  %v925_v8 = vld [vmem:[%s4396_s0] sm:$0xff]  ;;  %v926_v11 = vld [vmem:[%s4396_s0 + $0x8] sm:$0xff] }
  0x14   :  { %3265 = vmatprep.subr.bf16.mxu1 %v3264_v3  ;;  %934 = vperm.xlu0 %3451, %v925_v8   ;;  %v333_v10 = vld [vmem:[%s4397_s7] sm:$0xff] }
  0x15   :  { %3267 = vmatpush3.bf16.msra.mxu1 %v3264_v3  ;;  %940 = vperm.xlu1 %3452, %v927_v9  }
  0x16   :  { %3269 = vmatprep.subr.bf16.mxu1 %v3268_v7 }
  0x17   :  { %30 = vsyncpa [#allocation4], 0  ;;  %v928_v12 = vld [vmem:[%s4396_s0 + $0x18] sm:$0xff]  ;;  %v82_v13 = vld [vmem:[%s4395_s28 + $0x8] sm:$0xff]  ;;  %s4398_s29 = sld [smem:[#allocation7_spill]]  ;;  %vm341_vm1 = vcmask 64512  }
  0x18   :  { %937 = vperm.xlu0 %3451, %v926_v11   ;;  %v929_v15 = vld [vmem:[%s4396_s0 + $0x20] sm:$0xff]  ;;  %v930_v16 = vld [vmem:[%s4396_s0 + $0x28] sm:$0xff]  ;;  %s4399_s7 = sld [smem:[#allocation10_spill]]  ;;  %s4400_s9 = sld [smem:[#allocation12_spill]]  ;;  %vm542_vm2 = vcmask 1043456   ;;  %vm523_vm3 = vcmask 31744  }
  0x19   :  { %3271 = vmatpush3.bf16.msra.mxu1 %v3268_v7  ;;  %943 = vperm.xlu1 %3452, %v928_v12   ;;  %s4401_s8 = sld [smem:[#allocation15_spill]]  ;;  %v3921_v35 = vld [vmem:[%s4365_s13] sm:$0xff]  ;;  %vm969_vm5 = vcmask 130048   ;;  %vm4083_vm11 = vmpackc.low %vm523_vm3, %vm523_vm3  ;;  %s4405_s2 = sld [smem:[#allocation8_spill]]  ;;  %vm1555_vm14 = vcmask 392192  }
  0x1a   :  { %3014 = vmatprep.subr.mxu1 %v333_v10  ;;  %s3667_s3 = smov 116  }
  0x1c   :  { %3001 = vmatmul.mubr.msk.f32.vlgmr.msra.gmra.mrb[0].mxu1 %vm93_vm0, %v82_v13  ;;  %946 = vperm.xlu0 %3451, %v929_v15  }
  0x1d   :  { %v3842_v14 = vld [vmem:[%s4398_s29] sm:$0xff]  ;;  %3015 = vmatpush3.msra.mxu1 %v333_v10  ;;  %v3856_v17 = vld [vmem:[%s4398_s29 + $0x8] sm:$0xff]  ;;  %v3861_v18 = vld [vmem:[%s4398_s29 + $0x10] sm:$0xff]  ;;  %949 = vperm.xlu1 %3452, %v930_v16  }
  0x1e   :  { %3016 = vmatprep.mubr.msk.f32.mxu1 %vm341_vm1, %v3842_v14  ;;  %v3870_v19 = vld [vmem:[%s4398_s29 + $0x18] sm:$0xff]  ;;  %v3875_v20 = vld [vmem:[%s4398_s29 + $0x20] sm:$0xff]  ;;  %v3884_v21 = vld [vmem:[%s4398_s29 + $0x28] sm:$0xff] }
  0x1f   :  { %v89_v22 = vld [vmem:[%s4399_s7] sm:$0xff]  ;;  %v90_v23 = vld [vmem:[%s4399_s7 + $0x8] sm:$0xff]  ;;  %v91_v25 = vld [vmem:[%s4399_s7 + $0x10] sm:$0xff] }
  0x20   :  { %3017 = vmatmul.mubr.msk.f32.vlgmr.msra.gmra.mrb[2].mxu1 %vm341_vm1, %v3856_v17  ;;  %v3256_v24 = vpack.c.bf16 %v90_v23, %v89_v22  ;;  %v92_v26 = vld [vmem:[%s4399_s7 + $0x18] sm:$0xff]  ;;  %v254_v28 = vld [vmem:[%s4400_s9] sm:$0xff]  ;;  %v255_v29 = vld [vmem:[%s4400_s9 + $0x8] sm:$0xff]  ;;  %s3665_s7 = smov 120  }
  0x21   :  { %3019 = vmatprep.mubr.msk.f32.mxu1 %vm341_vm1, %v3861_v18  ;;  %v3260_v27 = vpack.c.bf16 %v92_v26, %v91_v25  ;;  %v3272_v30 = vpack.c.bf16 %v255_v29, %v254_v28  ;;  %v256_v31 = vld [vmem:[%s4400_s9 + $0x10] sm:$0xff]  ;;  %v257_v32 = vld [vmem:[%s4400_s9 + $0x18] sm:$0xff]  ;;  %v515_v34 = vld [vmem:[%s4401_s8] sm:$0xf]  ;;  %s4402_s9 = sld [smem:[#allocation14_spill]]  ;;  %s3672_s8 = smov [#allocation3]  }
  0x22   :  { %3257 = vmatprep.subr.bf16.mxu0 %v3256_v24  ;;  %v3276_v33 = vpack.c.bf16 %v257_v32, %v256_v31  ;;  %3436 = vmatprep.subr.msk.mxu1 %vm542_vm2, %v515_v34  ;;  %s2682_s29 = sshll.u32 %s3672_s8, 4  ;;  %s2683_s29 = int_to_ptr.vmem [resolvable:$true] %s2682_s29 }
  0x23   :  { %3259 = vmatpush3.bf16.msra.mxu0 %v3256_v24  ;;  %3437 = vmatpush3.msk.msra.mxu1 %vm542_vm2, %v515_v34  ;;  %s3637_s0 = scalar_lea.vmem %s2683_s29, 256  ;;  %p3642_p1 = scmp.lt.s32.totalorder %s2683_s29, %s2683_s29 }
  0x24   :  { %3020 = vmatmul.mubr.msk.f32.gmra.mrb[4].mxu1 %vm341_vm1, %v3870_v19  ;;  %3261 = vmatprep.subr.bf16.mxu0 %v3260_v27  ;;  %p3638_p0 = scmp.ne.s32.totalorder %s2683_s29, %s3637_s0  ;;  %p3643_p2 = scmp.lt.s32.totalorder %s3637_s0, %s3637_s0 }
  0x25   :  { %3022 = vmatprep.mubr.msk.f32.mxu1 %vm341_vm1, %v3875_v20  ;;  %3036 = vmatprep.subr.mxu1 %v3921_v35 }
  0x26   :  { %p3644_p3 = por %p3643_p2, %p3642_p1 }
  0x27   :  { %3263 = vmatpush3.bf16.msra.mxu0 %v3260_v27  ;;  %v2699_v39 = vld [vmem:[%s4402_s9] ss:$0 sm:$0xff] }
  0x28   :  { %3023 = vmatmul.mubr.msk.f32.gmra.mrb[6].mxu1 %vm341_vm1, %v3884_v21  ;;  %3273 = vmatprep.subr.bf16.mxu0 %v3272_v30  ;;  %p3645_p4 = pnand %p3644_p3, %p3638_p0 }
  0x2a   :  { %2990 = vmatmul.mubr.msk.f32.vlgmr.msra.gmra.mrb[0].mxu0 %vm93_vm0, %v82_v13 }
  0x2b   :  { %3275 = vmatpush3.bf16.msra.mxu0 %v3272_v30  ;;  %3011 = vmatprep.mubr.msk.f32.mxu0 %vm93_vm0, %v81_v5 }
  0x2c   :  { %3277 = vmatprep.subr.bf16.mxu0 %v3276_v33 }
  0x2f   :  { %3279 = vmatpush3.bf16.msra.mxu0 %v3276_v33 }
  0x30   :  { %3025 = vmatprep.subr.msk.mxu0 %vm542_vm2, %v515_v34 }
  0x32   :  { %3012 = vmatmul.mubr.msk.f32.vlgmr.msra.gmra.mrb[2].mxu0 %vm93_vm0, %v82_v13 }
  0x33   :  { %3026 = vmatpush3.msk.msra.mxu0 %vm542_vm2, %v515_v34 }
  0xef   :  { %v3002_v36 = vpop.f32.mrb[0].mxu1 }
  0xf0   :  { %v245_v37 = vpop.f32.mrb[1].mxu1 }
  0xf1   :  { %v3924_v38 = vpack.c.bf16 %v3002_v36, %v245_v37 }
  0xf3   :  { %v3018_v40 = vpop.f32.mrb[2].mxu1 }
  0xf4   :  { %v432_v41 = vadd.f32 %v3018_v40, %v2699_v39  ;;  %v426_v42 = vpop.f32.mrb[3].mxu1 }
  0xf5   :  { %v427_v43 = vadd.f32 %v2699_v39, %v426_v42 }
  0xf6   :  { %v462_v44 = vand.u32 2147483647, %v432_v41  ;;  %v456_v26 = vmax.f32 %v432_v41, 0.0 }
  0xf7   :  { %v461_v45 = vand.u32 2147483647, %v427_v43  ;;  %v3021_v46 = vpop.f32.mrb[4].mxu1  ;;  %v455_v28 = vmax.f32 %v427_v43, 0.0 }
  0xf8   :  { %v468_v47 = vsub.f32 0.0, %v462_v44  ;;  %v3929_v48 = vadd.f32 %v3021_v46, %v2699_v39  ;;  %v436_v49 = vpop.f32.mrb[5].mxu1 }
  0xf9   :  { %v467_v50 = vsub.f32 0.0, %v461_v45  ;;  %v3931_v51 = vadd.f32 %v2699_v39, %v436_v49 }
  0xfa   :  { %v475_v52 = vmul.f32 1.442695, %v468_v47  ;;  %v464_v53 = vand.u32 2147483647, %v3929_v48  ;;  %v458_v34 = vmax.f32 %v3929_v48, 0.0 }
  0xfb   :  { %v473_v54 = vmul.f32 1.442695, %v467_v50  ;;  %v463_v55 = vand.u32 2147483647, %v3931_v51  ;;  %v3024_v56 = vpop.f32.mrb[6].mxu1 }
  0xfc   :  { %3543 = vpow2.f32 %v475_v52  ;;  %v470_v57 = vsub.f32 0.0, %v464_v53  ;;  %v3935_v58 = vadd.f32 %v3024_v56, %v2699_v39  ;;  %v446_v59 = vpop.f32.mrb[7].mxu1  ;;  %v931_v56 = vlaneseq }
  0xfd   :  { %3545 = vpow2.f32 %v473_v54  ;;  %v469_v60 = vsub.f32 0.0, %v463_v55  ;;  %v447_v61 = vadd.f32 %v2699_v39, %v446_v59  ;;  %v457_v39 = vmax.f32 %v3931_v51, 0.0  ;;  %v941_v59 = vpop.permute.xlu1 %940 }
  0xfe   :  { %v479_v62 = vmul.f32 1.442695, %v470_v57  ;;  %v466_v63 = vand.u32 2147483647, %v3935_v58  ;;  %v460_v43 = vmax.f32 %v3935_v58, 0.0  ;;  %v935_v57 = vpop.permute.xlu0 %934  ;;  %v932_v58 = vand.u32 127, %v931_v56 }
  0xff   :  { %v477_v0 = vmul.f32 1.442695, %v469_v60  ;;  %v465_v1 = vand.u32 2147483647, %v447_v61  ;;  %v459_v48 = vmax.f32 %v447_v61, 0.0 }
 0x100   :  { %3547 = vpow2.f32 %v479_v62  ;;  %v472_v2 = vsub.f32 0.0, %v466_v63  ;;  %vm951_vm4 = vcmp.eq.s32.totalorder %v935_v57, %v932_v58  ;;  %vm953_vm6 = vcmp.eq.s32.totalorder %v941_v59, %v932_v58  ;;  %v3993_v63 = vpop.f32.mrb[0].mxu0 }
 0x101   :  { %3549 = vpow2.f32 %v477_v0  ;;  %v471_v3 = vsub.f32 0.0, %v465_v1  ;;  %v3995_v0 = vpop.f32.mrb[1].mxu0 }
 0x102   :  { %v483_v4 = vmul.f32 1.442695, %v472_v2  ;;  %v938_v60 = vpop.permute.xlu0 %937 }
 0x103   :  { %v481_v5 = vmul.f32 1.442695, %v471_v3  ;;  %vm952_vm7 = vcmp.eq.s32.totalorder %v938_v60, %v932_v58 }
 0x104   :  { %3551 = vpow2.f32 %v483_v4  ;;  %v804_v4 = vld [vmem:[%s4367_s15] sm:$0xff]  ;;  %s3666_s15 = smov 112  }
 0x105   :  { %3553 = vpow2.f32 %v481_v5  ;;  %v3013_v1 = vpop.f32.mrb[2].mxu0  ;;  %3047 = vmatprep.subr.mxu0 %v804_v4  ;;  %v1184_v5 = vld [vmem:[%s4363_s11] sm:$0xff] }
 0x106   :  { %v3544_v6 = vpop.eup %3543  ;;  %v324_v2 = vpop.f32.mrb[3].mxu0 }
 0x107   :  { %v3546_v7 = vpop.eup %3545  ;;  %v486_v8 = vadd.f32 1.0, %v3544_v6  ;;  %v3997_v3 = vpack.c.bf16 %v3013_v1, %v324_v2  ;;  %v1185_v6 = vld [vmem:[%s4363_s11 + $0x8] sm:$0xff]  ;;  %s3668_s11 = smov 104  }
 0x108   :  { %v485_v9 = vadd.f32 1.0, %v3546_v7  ;;  %v3288_v7 = vpack.c.bf16 %v1185_v6, %v1184_v5 }
 0x109   :  { %3555 = vlog2.f32 %v486_v8 }
 0x10a   :  { %v3548_v10 = vpop.eup %3547  ;;  %3557 = vlog2.f32 %v485_v9 }
 0x10b   :  { %v3550_v11 = vpop.eup %3549  ;;  %v488_v12 = vadd.f32 1.0, %v3548_v10 }
 0x10c   :  { %v487_v13 = vadd.f32 1.0, %v3550_v11 }
 0x10d   :  { %3559 = vlog2.f32 %v488_v12 }
 0x10e   :  { %v3552_v15 = vpop.eup %3551  ;;  %3561 = vlog2.f32 %v487_v13 }
 0x10f   :  { %v3554_v16 = vpop.eup %3553  ;;  %v490_v22 = vadd.f32 1.0, %v3552_v15  ;;  %v2720_v15 = vld [vmem:[%s4366_s14] ss:$0 sm:$0xff]  ;;  %s3669_s14 = smov 8  }
 0x110   :  { %v489_v23 = vadd.f32 1.0, %v3554_v16 }
 0x111   :  { %3563 = vlog2.f32 %v490_v22 }
 0x112   :  { %3565 = vlog2.f32 %v489_v23 }
 0x113   :  { %v3556_v24 = vpop.eup %3555 }
 0x114   :  { %v3558_v25 = vpop.eup %3557  ;;  %v494_v27 = vmul.f32 0.6931472, %v3556_v24 }
 0x115   :  { %v492_v29 = vmul.f32 0.6931472, %v3558_v25 }
 0x116   :  { %v504_v30 = vadd.f32 %v494_v27, %v456_v26 }
 0x117   :  { %v3560_v31 = vpop.eup %3559  ;;  %v503_v32 = vadd.f32 %v492_v29, %v455_v28 }
 0x118   :  { %v3562_v33 = vpop.eup %3561  ;;  %v498_v36 = vmul.f32 0.6931472, %v3560_v31  ;;  %v2707_v42 = vadd.f32 -0.6931472, %v504_v30 }
 0x119   :  { %v2706_v37 = vadd.f32 -0.6931472, %v503_v32  ;;  %v496_v40 = vmul.f32 0.6931472, %v3562_v33  ;;  %v2712_v33 = vld [vmem:[%s4362_s10] ss:$0 sm:$0xff] }
 0x11a   :  { %v506_v44 = vadd.f32 %v498_v36, %v458_v34  ;;  %s3670_s10 = smov 16  }
 0x11b   :  { %v3564_v45 = vpop.eup %3563  ;;  %v505_v46 = vadd.f32 %v496_v40, %v457_v39  ;;  %3027 = vmatprep.mubr.msk.f32.mxu0 %vm523_vm3, %v2706_v37 }
 0x11c   :  { %v3566_v41 = vpop.eup %3565  ;;  %v502_v47 = vmul.f32 0.6931472, %v3564_v45  ;;  %3028 = vmatmul.mubr.msk.f32.vlgmr.msra.gmra.mrb[4].mxu0 %vm523_vm3, %v2707_v42  ;;  %v2709_v52 = vadd.f32 -0.6931472, %v506_v44 }
 0x11d   :  { %v2708_v49 = vadd.f32 -0.6931472, %v505_v46  ;;  %v500_v50 = vmul.f32 0.6931472, %v3566_v41  ;;  %3048 = vmatpush3.msra.mxu0 %v804_v4 }
 0x11e   :  { %v508_v53 = vadd.f32 %v502_v47, %v460_v43  ;;  %3285 = vmatprep.subr.bf16.mxu0 %v3997_v3 }
 0x11f   :  { %v507_v54 = vadd.f32 %v500_v50, %v459_v48  ;;  %3030 = vmatprep.mubr.msk.f32.mxu0 %vm523_vm3, %v2708_v49 }
 0x120   :  { %3031 = vmatmul.mubr.msk.f32.gmra.mrb[6].mxu0 %vm523_vm3, %v2709_v52  ;;  %v2711_v55 = vadd.f32 -0.6931472, %v508_v53 }
 0x121   :  { %v2710_v51 = vadd.f32 -0.6931472, %v507_v54 }
 0x123   :  { %3033 = vmatprep.mubr.msk.f32.mxu1 %vm523_vm3, %v2710_v51 }
 0x124   :  { %3034 = vmatmul.mubr.msk.f32.vlgmr.msra.gmra.mrb[8].mxu1 %vm523_vm3, %v2711_v55 }
 0x125   :  { %3037 = vmatpush3.msra.mxu1 %v3921_v35  ;;  %3038 = vmatprep.mubr.msk.f32.mxu1 %vm341_vm1, %v3842_v14  ;;  %v3662_v14 = vmov 0.0  }
 0x126   :  { %3281 = vmatprep.subr.bf16.mxu1 %v3924_v38  ;;  %v3962_v35 = vsel %vm951_vm4, 1.0, %v3662_v14 }
 0x128   :  { %3039 = vmatmul.mubr.msk.f32.vlgmr.msra.gmra.mrb[10].mxu1 %vm341_vm1, %v3856_v17  ;;  %v944_v17 = vpop.permute.xlu1 %943 }
 0x129   :  { %3283 = vmatpush3.bf16.msra.mxu1 %v3924_v38  ;;  %3041 = vmatprep.mubr.msk.f32.mxu1 %vm341_vm1, %v3861_v18  ;;  %v3969_v18 = vsel %vm953_vm6, 1.0, %v3662_v14  ;;  %vm954_vm8 = vcmp.eq.s32.totalorder %v944_v17, %v932_v58 }
 0x12a   :  { %v3977_v38 = vsel %vm954_vm8, 1.0, %v3662_v14  ;;  %3289 = vmatprep.subr.bf16.mxu1 %v3288_v7  ;;  %vm1923_vm8 = vcmask 130112  }
 0x12c   :  { %3042 = vmatmul.mubr.msk.f32.gmra.mrb[12].mxu1 %vm341_vm1, %v3870_v19  ;;  %v947_v19 = vpop.permute.xlu0 %946  ;;  %v950_v61 = vpop.permute.xlu1 %949 }
 0x12d   :  { %3044 = vmatprep.mubr.msk.f32.mxu1 %vm341_vm1, %v3875_v20  ;;  %v3972_v20 = vsel %vm952_vm7, 1.0, %v3662_v14  ;;  %vm955_vm9 = vcmp.eq.s32.totalorder %v947_v19, %v932_v58  ;;  %vm956_vm10 = vcmp.eq.s32.totalorder %v950_v61, %v932_v58 }
 0x12e   :  { %v3989_v62 = vsel %vm956_vm10, 1.0, %v3662_v14  ;;  %vm2425_vm10 = vcmask 261312  }
 0x130   :  { %3045 = vmatmul.mubr.msk.f32.gmra.mrb[14].mxu1 %vm341_vm1, %v3884_v21  ;;  %v3982_v21 = vsel %vm955_vm9, 1.0, %v3662_v14  ;;  %vm2174_vm9 = vcmask 195712  }
 0x131   :  { %3062 = vmatprep.mubr.msk.f32.mxu1 %vm969_vm5, %v3962_v35 }
 0x134   :  { %3063 = vmatmul.mubr.msk.f32.vlgmr.msra.gmra.mrb[16].mxu1 %vm969_vm5, %v3972_v20 }
 0x135   :  { %3065 = vmatprep.mubr.msk.f32.mxu1 %vm969_vm5, %v3969_v18  ;;  %3291 = vmatpush3.bf16.msra.mxu1 %v3288_v7 }
 0x138   :  { %3066 = vmatmul.mubr.msk.f32.gmra.mrb[18].mxu1 %vm969_vm5, %v3977_v38 }
 0x139   :  { %3068 = vmatprep.mubr.msk.f32.mxu1 %vm969_vm5, %v3982_v21 }
 0x13c   :  { %3069 = vmatmul.mubr.msk.f32.gmra.mrb[20].mxu1 %vm969_vm5, %v3989_v62 }
 0x1ef   :  { %v3029_v8 = vpop.f32.mrb[4].mxu0 }
 0x1f0   :  { %v612_v9 = vpop.f32.mrb[5].mxu0  ;;  %v618_v43 = vadd.f32 %v3029_v8, %v2712_v33 }
 0x1f1   :  { %v613_v48 = vadd.f32 %v2712_v33, %v612_v9 }
 0x1f3   :  { %v3032_v10 = vpop.f32.mrb[6].mxu0 }
 0x1f4   :  { %v622_v11 = vpop.f32.mrb[7].mxu0  ;;  %v628_v59 = vadd.f32 %v3032_v10, %v2712_v33 }
 0x1f5   :  { %v623_v17 = vadd.f32 %v2712_v33, %v622_v11 }
 0x1f7   :  { %v3035_v12 = vpop.f32.mrb[8].mxu1 }
 0x1f8   :  { %v632_v13 = vpop.f32.mrb[9].mxu1  ;;  %v638_v6 = vadd.f32 %v3035_v12, %v2712_v33 }
 0x1f9   :  { %v633_v8 = vadd.f32 %v2712_v33, %v632_v13 }
 0x1fb   :  { %v3040_v16 = vpop.f32.mrb[10].mxu1 }
 0x1fc   :  { %v4012_v22 = vadd.f32 %v3040_v16, %v2720_v15  ;;  %v715_v23 = vpop.f32.mrb[11].mxu1 }
 0x1fd   :  { %v4014_v24 = vadd.f32 %v2720_v15, %v715_v23 }
 0x1fe   :  { %v751_v25 = vand.u32 2147483647, %v4012_v22 }
 0x1ff   :  { %v750_v26 = vand.u32 2147483647, %v4014_v24  ;;  %v3043_v27 = vpop.f32.mrb[12].mxu1 }
 0x200   :  { %v757_v28 = vsub.f32 0.0, %v751_v25  ;;  %v4018_v29 = vadd.f32 %v3043_v27, %v2720_v15  ;;  %v725_v30 = vpop.f32.mrb[13].mxu1 }
 0x201   :  { %v756_v31 = vsub.f32 0.0, %v750_v26  ;;  %v4020_v32 = vadd.f32 %v2720_v15, %v725_v30 }
 0x202   :  { %v764_v34 = vmul.f32 1.442695, %v757_v28  ;;  %v753_v36 = vand.u32 2147483647, %v4018_v29 }
 0x203   :  { %v762_v37 = vmul.f32 1.442695, %v756_v31  ;;  %v752_v39 = vand.u32 2147483647, %v4020_v32  ;;  %v3046_v40 = vpop.f32.mrb[14].mxu1 }
 0x204   :  { %3567 = vpow2.f32 %v764_v34  ;;  %v759_v42 = vsub.f32 0.0, %v753_v36  ;;  %v4027_v44 = vadd.f32 %v3046_v40, %v2720_v15  ;;  %v735_v45 = vpop.f32.mrb[15].mxu1  ;;  %v745_v36 = vmax.f32 %v4012_v22, 0.0 }
 0x205   :  { %3569 = vpow2.f32 %v762_v37  ;;  %v758_v46 = vsub.f32 0.0, %v752_v39  ;;  %v4029_v41 = vadd.f32 %v2720_v15, %v735_v45  ;;  %v744_v39 = vmax.f32 %v4014_v24, 0.0 }
 0x206   :  { %v768_v47 = vmul.f32 1.442695, %v759_v42  ;;  %v755_v49 = vand.u32 2147483647, %v4027_v44  ;;  %v749_v24 = vmax.f32 %v4027_v44, 0.0 }
 0x207   :  { %v766_v50 = vmul.f32 1.442695, %v758_v46  ;;  %v754_v52 = vand.u32 2147483647, %v4029_v41  ;;  %v3064_v53 = vpop.f32.mrb[16].mxu1 }
 0x208   :  { %3571 = vpow2.f32 %v768_v47  ;;  %v761_v54 = vsub.f32 0.0, %v755_v49  ;;  %v1179_v51 = vmul.f32 %v3064_v53, %v618_v43  ;;  %v1054_v55 = vpop.f32.mrb[17].mxu1  ;;  %v747_v47 = vmax.f32 %v4018_v29, 0.0 }
 0x209   :  { %3573 = vpow2.f32 %v766_v50  ;;  %v760_v57 = vsub.f32 0.0, %v754_v52  ;;  %v1178_v58 = vmul.f32 %v1054_v55, %v613_v48  ;;  %v746_v50 = vmax.f32 %v4020_v32, 0.0 }
 0x20a   :  { %v772_v60 = vmul.f32 1.442695, %v761_v54  ;;  %v748_v29 = vmax.f32 %v4029_v41, 0.0 }
 0x20b   :  { %v770_v19 = vmul.f32 1.442695, %v760_v57  ;;  %v3067_v61 = vpop.f32.mrb[18].mxu1  ;;  %3088 = vmatprep.mubr.msk.f32.mxu1 %vm969_vm5, %v1178_v58 }
 0x20c   :  { %3575 = vpow2.f32 %v772_v60  ;;  %v1181_v1 = vmul.f32 %v3067_v61, %v628_v59  ;;  %v1064_v2 = vpop.f32.mrb[19].mxu1  ;;  %3089 = vmatmul.mubr.msk.f32.vlgmr.msra.gmra.mrb[22].mxu1 %vm969_vm5, %v1179_v51 }
 0x20d   :  { %3577 = vpow2.f32 %v770_v19  ;;  %v1180_v4 = vmul.f32 %v1064_v2, %v623_v17 }
 0x20e   :  { %v3568_v5 = vpop.eup %3567 }
 0x20f   :  { %v3570_v7 = vpop.eup %3569  ;;  %v775_v9 = vadd.f32 1.0, %v3568_v5  ;;  %v3070_v15 = vpop.f32.mrb[20].mxu1  ;;  %3091 = vmatprep.mubr.msk.f32.mxu1 %vm969_vm5, %v1180_v4 }
 0x210   :  { %v774_v10 = vadd.f32 1.0, %v3570_v7  ;;  %v1183_v11 = vmul.f32 %v3070_v15, %v638_v6  ;;  %v1074_v16 = vpop.f32.mrb[21].mxu1  ;;  %3092 = vmatmul.mubr.msk.f32.gmra.mrb[24].mxu1 %vm969_vm5, %v1181_v1 }
 0x211   :  { %3579 = vlog2.f32 %v775_v9  ;;  %v1182_v23 = vmul.f32 %v1074_v16, %v633_v8 }
 0x212   :  { %v3572_v25 = vpop.eup %3571  ;;  %3581 = vlog2.f32 %v774_v10 }
 0x213   :  { %v3574_v26 = vpop.eup %3573  ;;  %v777_v27 = vadd.f32 1.0, %v3572_v25  ;;  %3094 = vmatprep.mubr.msk.f32.mxu1 %vm969_vm5, %v1182_v23 }
 0x214   :  { %v776_v12 = vadd.f32 1.0, %v3574_v26  ;;  %3095 = vmatmul.mubr.msk.f32.gmra.mrb[26].mxu1 %vm969_vm5, %v1183_v11 }
 0x215   :  { %3583 = vlog2.f32 %v777_v27  ;;  %3126 = vmatprep.mubr.msk.f32.mxu1 %vm523_vm3, %v3995_v0 }
 0x216   :  { %v3576_v13 = vpop.eup %3575  ;;  %3585 = vlog2.f32 %v776_v12 }
 0x217   :  { %v3578_v28 = vpop.eup %3577  ;;  %v779_v30 = vadd.f32 1.0, %v3576_v13 }
 0x218   :  { %v778_v31 = vadd.f32 1.0, %v3578_v28 }
 0x219   :  { %3587 = vlog2.f32 %v779_v30 }
 0x21a   :  { %3589 = vlog2.f32 %v778_v31 }
 0x21b   :  { %v3580_v33 = vpop.eup %3579 }
 0x21c   :  { %v3582_v34 = vpop.eup %3581  ;;  %v783_v37 = vmul.f32 0.6931472, %v3580_v33  ;;  %v2733_v33 = vld [vmem:[%s4368_s16] ss:$0 sm:$0xff] }
 0x21d   :  { %v781_v40 = vmul.f32 0.6931472, %v3582_v34 }
 0x21e   :  { %v793_v42 = vadd.f32 %v783_v37, %v745_v36 }
 0x21f   :  { %v3584_v45 = vpop.eup %3583  ;;  %v792_v46 = vadd.f32 %v781_v40, %v744_v39 }
 0x220   :  { %v3586_v43 = vpop.eup %3585  ;;  %v787_v49 = vmul.f32 0.6931472, %v3584_v45  ;;  %v2728_v53 = vadd.f32 -0.6931472, %v793_v42 }
 0x221   :  { %v2727_v48 = vadd.f32 -0.6931472, %v792_v46  ;;  %v785_v52 = vmul.f32 0.6931472, %v3586_v43 }
 0x222   :  { %v795_v54 = vadd.f32 %v787_v49, %v747_v47 }
 0x223   :  { %v3588_v51 = vpop.eup %3587  ;;  %v794_v55 = vadd.f32 %v785_v52, %v746_v50  ;;  %3049 = vmatprep.mubr.msk.f32.mxu0 %vm341_vm1, %v2727_v48 }
 0x224   :  { %v3590_v22 = vpop.eup %3589  ;;  %v791_v57 = vmul.f32 0.6931472, %v3588_v51  ;;  %3050 = vmatmul.mubr.msk.f32.vlgmr.msra.gmra.mrb[8].mxu0 %vm341_vm1, %v2728_v53  ;;  %v2730_v32 = vadd.f32 -0.6931472, %v795_v54 }
 0x225   :  { %v2729_v58 = vadd.f32 -0.6931472, %v794_v55  ;;  %v789_v59 = vmul.f32 0.6931472, %v3590_v22  ;;  %3287 = vmatpush3.bf16.msra.mxu0 %v3997_v3  ;;  %v1312_v3 = vld [vmem:[%s4369_s17] sm:$0xff] }
 0x226   :  { %v797_v60 = vadd.f32 %v791_v57, %v749_v24  ;;  %v1438_v57 = vshrl.u32 %v931_v56, 7 }
 0x227   :  { %v796_v17 = vadd.f32 %v789_v59, %v748_v29  ;;  %3052 = vmatprep.mubr.msk.f32.mxu0 %vm341_vm1, %v2729_v58  ;;  %v4122_v29 = vld [vmem:[%s4405_s2] ss:$0 sm:$0xff] }
 0x228   :  { %3053 = vmatmul.mubr.msk.f32.gmra.mrb[10].mxu0 %vm341_vm1, %v2730_v32  ;;  %v2732_v61 = vadd.f32 -0.6931472, %v797_v60  ;;  %v4117_v58 = vadd.s32 8, %v1438_v57  ;;  %vm1444_vm13 = vcmp.eq.s32.totalorder %v4122_v29, %v1438_v57  ;;  %v3663_v32 = vmov -1e+09  }
 0x229   :  { %v2731_v19 = vadd.f32 -0.6931472, %v796_v17 }
 0x22a   :  { %vm1445_vm12 = vcmp.eq.s32.totalorder %v4122_v29, %v4117_v58 }
 0x22b   :  { %3055 = vmatprep.mubr.msk.f32.mxu0 %vm341_vm1, %v2731_v19  ;;  %v4130_v60 = vsel %vm1445_vm12, 0.0, %v3663_v32  ;;  %v4134_v19 = vsel %vm1444_vm13, 0.0, %v3663_v32 }
 0x22c   :  { %3056 = vmatmul.mubr.msk.f32.gmra.mrb[12].mxu0 %vm341_vm1, %v2732_v61 }
 0x22d   :  { %3075 = vmatprep.mubr.msk.f32.mxu0 %vm969_vm5, %v3962_v35  ;;  %v1313_v35 = vld [vmem:[%s4369_s17 + $0x8] sm:$0xff] }
 0x230   :  { %3076 = vmatmul.mubr.msk.f32.vlgmr.msra.gmra.mrb[14].mxu0 %vm969_vm5, %v3972_v20  ;;  %v3292_v20 = vpack.c.bf16 %v1313_v35, %v1312_v3 }
 0x231   :  { %3078 = vmatprep.mubr.msk.f32.mxu0 %vm969_vm5, %v3969_v18  ;;  %v1314_v18 = vld [vmem:[%s4369_s17 + $0x10] sm:$0xff] }
 0x232   :  { %3293 = vmatprep.subr.bf16.mxu0 %v3292_v20 }
 0x233   :  { %3295 = vmatpush3.bf16.msra.mxu0 %v3292_v20 }
 0x234   :  { %3079 = vmatmul.mubr.msk.f32.gmra.mrb[16].mxu0 %vm969_vm5, %v3977_v38  ;;  %v1315_v38 = vld [vmem:[%s4369_s17 + $0x18] sm:$0xff] }
 0x235   :  { %3081 = vmatprep.mubr.msk.f32.mxu0 %vm969_vm5, %v3982_v21  ;;  %v3296_v21 = vpack.c.bf16 %v1315_v38, %v1314_v18  ;;  %v2765_v38 = vld [vmem:[%s4370_s18] ss:$0 sm:$0xff]  ;;  %s3664_s18 = smov 124  }
 0x237   :  { %3297 = vmatprep.subr.bf16.mxu0 %v3296_v21 }
 0x238   :  { %3082 = vmatmul.mubr.msk.f32.gmra.mrb[18].mxu0 %vm969_vm5, %v3989_v62  ;;  %v2758_v62 = vld [vmem:[%s4364_s12] ss:$0 sm:$0xff] }
 0x239   :  { %3299 = vmatpush3.bf16.msra.mxu0 %v3296_v21 }
 0x2df   :  { %v3090_v44 = vpop.f32.mrb[22].mxu1 }
 0x2e0   :  { %v1283_v41 = vadd.f32 %v3090_v44, %v2758_v62  ;;  %v1277_v1 = vpop.f32.mrb[23].mxu1 }
 0x2e1   :  { %v1278_v2 = vadd.f32 %v2758_v62, %v1277_v1 }
 0x2e3   :  { %v3093_v5 = vpop.f32.mrb[24].mxu1  ;;  %v3300_v6 = vpack.c.bf16 %v1283_v41, %v1278_v2  ;;  %v4087_v7 = vpack.i.bf16 %v1283_v41, %v1278_v2 }
 0x2e4   :  { %v1293_v8 = vadd.f32 %v3093_v5, %v2758_v62  ;;  %v1287_v9 = vpop.f32.mrb[25].mxu1 }
 0x2e5   :  { %v1288_v15 = vadd.f32 %v2758_v62, %v1287_v9  ;;  %3302 = vmatprep.subr.msk.bf16.mxu1 %vm4083_vm11, %v3300_v6 }
 0x2e6   :  { %3305 = vmatpush3.bf16.xpose.msk.msra.mxu1 %vm4083_vm11, %v3300_v6 }
 0x2e7   :  { %v3096_v10 = vpop.f32.mrb[26].mxu1  ;;  %v3306_v11 = vpack.c.bf16 %v1293_v8, %v1288_v15  ;;  %v4093_v16 = vpack.i.bf16 %v1293_v8, %v1288_v15 }
 0x2e8   :  { %v1303_v23 = vadd.f32 %v3096_v10, %v2758_v62  ;;  %v1297_v25 = vpop.f32.mrb[27].mxu1 }
 0x2e9   :  { %v1298_v26 = vadd.f32 %v2758_v62, %v1297_v25  ;;  %3308 = vmatprep.subr.msk.bf16.mxu1 %vm4083_vm11, %v3306_v11 }
 0x2eb   :  { %v3312_v27 = vpack.c.bf16 %v1303_v23, %v1298_v26  ;;  %v4097_v12 = vpack.i.bf16 %v1303_v23, %v1298_v26 }
 0x2ee   :  { %3311 = vmatpush3.bf16.xpose.msk.msra.mxu1 %vm4083_vm11, %v3306_v11 }
 0x2ef   :  { %3314 = vmatprep.subr.msk.bf16.mxu1 %vm4083_vm11, %v3312_v27 }
 0x2f6   :  { %3317 = vmatpush3.bf16.xpose.msk.msra.mxu1 %vm4083_vm11, %v3312_v27 }
 0x2f7   :  { %v3051_v13 = vpop.f32.mrb[8].mxu0 }
 0x2f8   :  { %v896_v28 = vpop.f32.mrb[9].mxu0  ;;  %v902_v37 = vadd.f32 %v3051_v13, %v2733_v33 }
 0x2f9   :  { %v897_v39 = vadd.f32 %v2733_v33, %v896_v28 }
 0x2fb   :  { %v3054_v30 = vpop.f32.mrb[10].mxu0 }
 0x2fc   :  { %v906_v31 = vpop.f32.mrb[11].mxu0  ;;  %v912_v43 = vadd.f32 %v3054_v30, %v2733_v33 }
 0x2fd   :  { %3127 = vmatmul.mubr.msk.f32.vlgmr.msra.gmra.mrb[28].mxu1 %vm523_vm3, %v3993_v63  ;;  %v907_v47 = vadd.f32 %v2733_v33, %v906_v31 }
 0x2ff   :  { %v3057_v34 = vpop.f32.mrb[12].mxu0 }
 0x300   :  { %v916_v36 = vpop.f32.mrb[13].mxu0  ;;  %v922_v53 = vadd.f32 %v3057_v34, %v2733_v33 }
 0x301   :  { %v917_v54 = vadd.f32 %v2733_v33, %v916_v36 }
 0x303   :  { %v3077_v40 = vpop.f32.mrb[14].mxu0 }
 0x304   :  { %v1307_v42 = vmul.f32 %v3077_v40, %v902_v37  ;;  %v1149_v45 = vpop.f32.mrb[15].mxu0 }
 0x305   :  { %v1306_v46 = vmul.f32 %v1149_v45, %v897_v39  ;;  %v4160_v45 = vsel %vm1444_vm13, 1.0, %v3662_v14 }
 0x307   :  { %v3080_v49 = vpop.f32.mrb[16].mxu0  ;;  %3105 = vmatprep.mubr.msk.f32.mxu0 %vm93_vm0, %v1306_v46 }
 0x308   :  { %v1309_v48 = vmul.f32 %v3080_v49, %v912_v43  ;;  %v1159_v50 = vpop.f32.mrb[17].mxu0  ;;  %3106 = vmatmul.mubr.msk.f32.vlgmr.msra.gmra.mrb[20].mxu0 %vm93_vm0, %v1307_v42 }
 0x309   :  { %v1308_v52 = vmul.f32 %v1159_v50, %v907_v47  ;;  %v4166_v47 = vsel %vm1445_vm12, 1.0, %v3662_v14 }
 0x30b   :  { %v3083_v51 = vpop.f32.mrb[18].mxu0  ;;  %3108 = vmatprep.mubr.msk.f32.mxu0 %vm93_vm0, %v1308_v52 }
 0x30c   :  { %v1311_v55 = vmul.f32 %v3083_v51, %v922_v53  ;;  %v1169_v22 = vpop.f32.mrb[19].mxu0  ;;  %3109 = vmatmul.mubr.msk.f32.gmra.mrb[22].mxu0 %vm93_vm0, %v1309_v48 }
 0x30d   :  { %v1310_v24 = vmul.f32 %v1169_v22, %v917_v54 }
 0x30f   :  { %3111 = vmatprep.mubr.msk.f32.mxu0 %vm93_vm0, %v1310_v24 }
 0x310   :  { %3112 = vmatmul.mubr.msk.f32.gmra.mrb[24].mxu0 %vm93_vm0, %v1311_v55 }
 0x3d0   :  { %v3128_v59 = vpop.f32.mrb[28].mxu1 }
 0x3d1   :  { %v1552_v56 = vmul.f32 0.5, %v3128_v59  ;;  %v1542_v17 = vpop.f32.mrb[29].mxu1 }
 0x3d2   :  { %v1551_v61 = vmul.f32 0.5, %v1542_v17 }
 0x3d3   :  { %v1554_v3 = vadd.f32 %v1552_v56, %v4130_v60 }
 0x3d4   :  { %v1553_v35 = vadd.f32 %v1551_v61, %v4134_v19 }
 0x3d5   :  { %v1559_v20 = vsel %vm1555_vm14, %v1554_v3, -inf }
 0x3d6   :  { %1560 = vmax.xlane.f32.xlu1 %v1559_v20  ;;  %v1556_v18 = vsel %vm1555_vm14, %v1553_v35, -inf }
 0x3d7   :  { %1557 = vmax.xlane.f32.xlu0 %v1556_v18 }
 0x3db   :  { %v3107_v21 = vpop.f32.mrb[20].mxu0 }
 0x3dc   :  { %v1413_v62 = vadd.f32 %v3107_v21, %v2765_v38  ;;  %v1407_v44 = vpop.f32.mrb[21].mxu0 }
 0x3dd   :  { %v1408_v41 = vadd.f32 %v2765_v38, %v1407_v44 }
 0x3df   :  { %v3110_v1 = vpop.f32.mrb[22].mxu0  ;;  %v3318_v2 = vpack.c.bf16 %v1413_v62, %v1408_v41  ;;  %v4143_v5 = vpack.i.bf16 %v1413_v62, %v1408_v41 }
 0x3e0   :  { %v1423_v6 = vadd.f32 %v3110_v1, %v2765_v38  ;;  %v1417_v8 = vpop.f32.mrb[23].mxu0 }
 0x3e1   :  { %v1418_v9 = vadd.f32 %v2765_v38, %v1417_v8  ;;  %3319 = vmatprep.subr.bf16.mxu0 %v3318_v2 }
 0x3e2   :  { %3321 = vmatpush3.bf16.msra.mxu0 %v3318_v2 }
 0x3e3   :  { %v3113_v15 = vpop.f32.mrb[24].mxu0  ;;  %v3322_v10 = vpack.c.bf16 %v1423_v6, %v1418_v9  ;;  %v4145_v11 = vpack.i.bf16 %v1423_v6, %v1418_v9 }
 0x3e4   :  { %v1433_v23 = vadd.f32 %v3113_v15, %v2765_v38  ;;  %v1427_v25 = vpop.f32.mrb[25].mxu0 }
 0x3e5   :  { %v1428_v26 = vadd.f32 %v2765_v38, %v1427_v25  ;;  %3323 = vmatprep.subr.bf16.mxu0 %v3322_v10 }
 0x3e6   :  { %3325 = vmatpush3.bf16.msra.mxu0 %v3322_v10 }
 0x3e7   :  { %3454 = vrot.lane.b32.xlu1 %v4087_v7, %s3664_s18  ;;  %v3326_v27 = vpack.c.bf16 %v1433_v23, %v1428_v26  ;;  %v4149_v13 = vpack.i.bf16 %v1433_v23, %v1428_v26 }
 0x3e9   :  { %3327 = vmatprep.subr.bf16.mxu0 %v3326_v27 }
 0x3ea   :  { %3329 = vmatpush3.bf16.msra.mxu0 %v3326_v27 }
 0x3eb   :  { %3464 = vrot.lane.b32.xlu1 %v4097_v12, %s3664_s18 }
 0x3ef   :  { %1669 = vrot.lane.b32.xlu1 %v3995_v0, %s3664_s18 }
 0x463   :  { %v1561_v28 = vpop.xlane.xlu1 %1560 }
 0x464   :  { %v1563_v30 = vsub.f32 %v1554_v3, %v1561_v28  ;;  %v1558_v31 = vpop.xlane.xlu0 %1557 }
 0x465   :  { %v1562_v33 = vsub.f32 %v1553_v35, %v1558_v31 }
 0x466   :  { %v1566_v34 = vmul.f32 1.442695, %v1563_v30 }
 0x467   :  { %v1564_v36 = vmul.f32 1.442695, %v1562_v33  ;;  %v3455_v37 = vpop.permute.xlu1 %3454 }
 0x468   :  { %3591 = vpow2.f32 %v1566_v34  ;;  %v3457_v39 = vunpack.i.h.bf16 %v3455_v37  ;;  %v3456_v40 = vunpack.i.l.bf16 %v3455_v37 }
 0x469   :  { %3593 = vpow2.f32 %v1564_v36 }
 0x46a   :  { %v3330_v42 = vpack.c.bf16 %v3457_v39, %v3456_v40 }
 0x46b   :  { %v3465_v24 = vpop.permute.xlu1 %3464 }
 0x46c   :  { %3332 = vmatprep.subr.msk.bf16.mxu0 %vm4083_vm11, %v3330_v42  ;;  %v3467_v61 = vunpack.i.h.bf16 %v3465_v24  ;;  %v3466_v3 = vunpack.i.l.bf16 %v3465_v24 }
 0x46e   :  { %v3342_v35 = vpack.c.bf16 %v3467_v61, %v3466_v3 }
 0x46f   :  { %v1670_v56 = vpop.permute.xlu1 %1669 }
 0x472   :  { %v3592_v46 = vpop.eup %3591 }
 0x473   :  { %v3594_v43 = vpop.eup %3593  ;;  %v1569_v50 = vmul.f32 %v3592_v46, %v4166_v47 }
 0x474   :  { %v1568_v49 = vmul.f32 %v3594_v43, %v4160_v45 }
 0x475   :  { %v1573_v52 = vsel %vm1555_vm14, %v1569_v50, 0.0 }
 0x476   :  { %v1570_v48 = vsel %vm1555_vm14, %v1568_v49, 0.0 }
 0x477   :  { %1571 = vadd.xlane.f32.xlu0 %v1570_v48 }
 0x47b   :  { %1574 = vadd.xlane.f32.xlu0 %v1573_v52 }
 0x491   :  { %3459 = vrot.lane.b32.xlu0 %v4093_v16, %s3664_s18 }
 0x495   :  { %1671 = vrot.lane.b32.xlu0 %v3993_v63, %s3664_s18 }
 0x504   :  { %v1572_v53 = vpop.xlane.xlu0 %1571 }
 0x505   :  { %vm1576_vm15 = vcmp.gt.f32.partialorder %v1572_v53, 0.0 }
 0x506   :  { %v1578_v14 = vsel %vm1576_vm15, %v1572_v53, 1.0 }
 0x507   :  { %3595 = vrcp.f32 %v1578_v14 }
 0x508   :  { %v1575_v54 = vpop.xlane.xlu0 %1574 }
 0x509   :  { %vm1577_vm2 = vcmp.gt.f32.partialorder %v1575_v54, 0.0 }
 0x50a   :  { %v1579_v51 = vsel %vm1577_vm2, %v1575_v54, 1.0 }
 0x50b   :  { %3597 = vrcp.f32 %v1579_v51 }
 0x50c   :  { %v3460_v22 = vpop.permute.xlu0 %3459 }
 0x50d   :  { %v3462_v58 = vunpack.i.h.bf16 %v3460_v22  ;;  %v3461_v29 = vunpack.i.l.bf16 %v3460_v22 }
 0x50f   :  { %v3336_v17 = vpack.c.bf16 %v3462_v58, %v3461_v29 }
 0x510   :  { %v1672_v20 = vpop.permute.xlu0 %1671 }
 0x511   :  { %v3596_v55 = vpop.eup %3595 }
 0x512   :  { %v1584_v57 = vmul.f32 %v3596_v55, %v1568_v49 }
 0x514   :  { %3141 = vmatprep.mubr.msk.f32.mxu0 %vm1555_vm14, %v1584_v57 }
 0x515   :  { %v3598_v59 = vpop.eup %3597 }
 0x516   :  { %v1585_v32 = vmul.f32 %v3598_v59, %v1569_v50 }
 0x518   :  { %3142 = vmatmul.mubr.msk.f32.vlgmr.msra.gmra.mrb[26].mxu0 %vm1555_vm14, %v1585_v32 }
 0x519   :  { %3335 = vmatpush3.bf16.xpose.msk.msra.mxu0 %vm4083_vm11, %v3330_v42  ;;  %3156 = vmatprep.mubr.msk.f32.mxu0 %vm523_vm3, %v1670_v56 }
 0x51a   :  { %3338 = vmatprep.subr.msk.bf16.mxu0 %vm4083_vm11, %v3336_v17 }
 0x521   :  { %3341 = vmatpush3.bf16.xpose.msk.msra.mxu0 %vm4083_vm11, %v3336_v17 }
 0x522   :  { %3344 = vmatprep.subr.msk.bf16.mxu0 %vm4083_vm11, %v3342_v35 }
 0x529   :  { %3347 = vmatpush3.bf16.xpose.msk.msra.mxu0 %vm4083_vm11, %v3342_v35 }
 0x530   :  { %3157 = vmatmul.mubr.msk.f32.vlgmr.msra.gmra.mrb[28].mxu0 %vm523_vm3, %v1672_v20 }
 0x5eb   :  { %v3143_v18 = vpop.f32.mrb[26].mxu0 }
 0x5ec   :  { %1668 = vst.msk [vmem:[#allocation2 + $0x8] sm:$0xff] %vm341_vm1, %v3143_v18  ;;  %v1658_v38 = vpop.f32.mrb[27].mxu0 }
 0x5ed   :  { %1667 = vst.msk [vmem:[#allocation2] sm:$0xff] %vm341_vm1, %v1658_v38 }
 0x603   :  { %v3158_v21 = vpop.f32.mrb[28].mxu0 }
 0x604   :  { %v1777_v62 = vmul.f32 0.5, %v3158_v21  ;;  %v1767_v44 = vpop.f32.mrb[29].mxu0 }
 0x605   :  { %v1776_v41 = vmul.f32 0.5, %v1767_v44 }
 0x606   :  { %v1779_v1 = vadd.f32 %v1777_v62, %v4130_v60 }
 0x607   :  { %v1778_v2 = vadd.f32 %v1776_v41, %v4134_v19 }
 0x608   :  { %v1783_v6 = vsel %vm1555_vm14, %v1779_v1, -inf }
 0x609   :  { %1784 = vmax.xlane.f32.xlu0 %v1783_v6  ;;  %v1780_v8 = vsel %vm1555_vm14, %v1778_v2, -inf }
 0x60a   :  { %1781 = vmax.xlane.f32.xlu1 %v1780_v8 }
 0x61b   :  { %3474 = vrot.lane.b32.xlu1 %v4145_v11, %s3665_s7 }
 0x61f   :  { %3469 = vrot.lane.b32.xlu0 %v4143_v5, %s3665_s7  ;;  %3479 = vrot.lane.b32.xlu1 %v4149_v13, %s3665_s7 }
 0x696   :  { %v1785_v9 = vpop.xlane.xlu0 %1784 }
 0x697   :  { %v1787_v15 = vsub.f32 %v1779_v1, %v1785_v9  ;;  %v1782_v10 = vpop.xlane.xlu1 %1781 }
 0x698   :  { %v1786_v23 = vsub.f32 %v1778_v2, %v1782_v10 }
 0x699   :  { %v1790_v25 = vmul.f32 1.442695, %v1787_v15 }
 0x69a   :  { %v1788_v26 = vmul.f32 1.442695, %v1786_v23  ;;  %v3470_v27 = vpop.permute.xlu0 %3469 }
 0x69b   :  { %3599 = vpow2.f32 %v1790_v25  ;;  %v3472_v28 = vunpack.i.h.bf16 %v3470_v27  ;;  %v3471_v30 = vunpack.i.l.bf16 %v3470_v27  ;;  %v3475_v31 = vpop.permute.xlu1 %3474 }
 0x69c   :  { %3601 = vpow2.f32 %v1788_v26  ;;  %v3477_v33 = vunpack.i.h.bf16 %v3475_v31  ;;  %v3476_v34 = vunpack.i.l.bf16 %v3475_v31 }
 0x69d   :  { %v3348_v36 = vpack.c.bf16 %v3472_v28, %v3471_v30 }
 0x69e   :  { %v3352_v37 = vpack.c.bf16 %v3477_v33, %v3476_v34 }
 0x69f   :  { %3349 = vmatprep.subr.bf16.mxu1 %v3348_v36  ;;  %v3480_v39 = vpop.permute.xlu1 %3479 }
 0x6a0   :  { %v3482_v40 = vunpack.i.h.bf16 %v3480_v39  ;;  %v3481_v42 = vunpack.i.l.bf16 %v3480_v39  ;;  %3351 = vmatpush3.bf16.msra.mxu1 %v3348_v36 }
 0x6a1   :  { %3353 = vmatprep.subr.bf16.mxu1 %v3352_v37 }
 0x6a2   :  { %v3356_v46 = vpack.c.bf16 %v3482_v40, %v3481_v42 }
 0x6a4   :  { %3355 = vmatpush3.bf16.msra.mxu1 %v3352_v37 }
 0x6a5   :  { %v3600_v43 = vpop.eup %3599  ;;  %3357 = vmatprep.subr.bf16.mxu1 %v3356_v46 }
 0x6a6   :  { %v3602_v49 = vpop.eup %3601  ;;  %v1793_v48 = vmul.f32 %v3600_v43, %v4166_v47 }
 0x6a7   :  { %v1792_v50 = vmul.f32 %v3602_v49, %v4160_v45 }
 0x6a8   :  { %3359 = vmatpush3.bf16.msra.mxu1 %v3356_v46  ;;  %v1797_v52 = vsel %vm1555_vm14, %v1793_v48, 0.0 }
 0x6a9   :  { %1798 = vadd.xlane.f32.xlu1 %v1797_v52  ;;  %v1794_v53 = vsel %vm1555_vm14, %v1792_v50, 0.0 }
 0x6aa   :  { %1795 = vadd.xlane.f32.xlu0 %v1794_v53 }
 0x6ba   :  { %3489 = vrot.lane.b32.xlu1 %v4093_v16, %s3665_s7 }
 0x6be   :  { %1926 = vrot.lane.b32.xlu1 %v3995_v0, %s3665_s7 }
 0x6c0   :  { %3484 = vrot.lane.b32.xlu0 %v4087_v7, %s3665_s7 }
 0x6c4   :  { %3494 = vrot.lane.b32.xlu0 %v4097_v12, %s3665_s7 }
 0x6c8   :  { %1928 = vrot.lane.b32.xlu0 %v3993_v63, %s3665_s7 }
 0x736   :  { %v1799_v14 = vpop.xlane.xlu1 %1798 }
 0x737   :  { %vm1801_vm1 = vcmp.gt.f32.partialorder %v1799_v14, 0.0  ;;  %v1796_v54 = vpop.xlane.xlu0 %1795 }
 0x738   :  { %v1803_v51 = vsel %vm1801_vm1, %v1799_v14, 1.0  ;;  %vm1800_vm4 = vcmp.gt.f32.partialorder %v1796_v54, 0.0 }
 0x739   :  { %3603 = vrcp.f32 %v1803_v51  ;;  %v1802_v55 = vsel %vm1800_vm4, %v1796_v54, 1.0 }
 0x73a   :  { %3605 = vrcp.f32 %v1802_v55  ;;  %v3490_v29 = vpop.permute.xlu1 %3489 }
 0x73b   :  { %v3485_v22 = vpop.permute.xlu0 %3484  ;;  %v3492_v56 = vunpack.i.h.bf16 %v3490_v29  ;;  %v3491_v17 = vunpack.i.l.bf16 %v3490_v29 }
 0x73c   :  { %v3487_v24 = vunpack.i.h.bf16 %v3485_v22  ;;  %v3486_v57 = vunpack.i.l.bf16 %v3485_v22 }
 0x73d   :  { %v3366_v35 = vpack.c.bf16 %v3492_v56, %v3491_v17 }
 0x73e   :  { %v3360_v58 = vpack.c.bf16 %v3487_v24, %v3486_v57  ;;  %v1927_v20 = vpop.permute.xlu1 %1926 }
 0x73f   :  { %v3495_v18 = vpop.permute.xlu0 %3494 }
 0x740   :  { %3362 = vmatprep.subr.msk.bf16.mxu1 %vm4083_vm11, %v3360_v58  ;;  %v3497_v38 = vunpack.i.h.bf16 %v3495_v18  ;;  %v3496_v21 = vunpack.i.l.bf16 %v3495_v18 }
 0x742   :  { %v3372_v62 = vpack.c.bf16 %v3497_v38, %v3496_v21 }
 0x743   :  { %v3604_v59 = vpop.eup %3603  ;;  %v1929_v44 = vpop.permute.xlu0 %1928 }
 0x744   :  { %v3606_v32 = vpop.eup %3605  ;;  %v1809_v3 = vmul.f32 %v3604_v59, %v1793_v48 }
 0x745   :  { %v1808_v61 = vmul.f32 %v3606_v32, %v1792_v50 }
 0x747   :  { %3171 = vmatprep.mubr.msk.f32.mxu1 %vm1555_vm14, %v1808_v61 }
 0x748   :  { %3172 = vmatmul.mubr.msk.f32.vlgmr.msra.gmra.mrb[30].mxu1 %vm1555_vm14, %v1809_v3 }
 0x749   :  { %3365 = vmatpush3.bf16.xpose.msk.msra.mxu1 %vm4083_vm11, %v3360_v58  ;;  %3186 = vmatprep.mubr.msk.f32.mxu1 %vm523_vm3, %v1927_v20 }
 0x74a   :  { %3368 = vmatprep.subr.msk.bf16.mxu1 %vm4083_vm11, %v3366_v35 }
 0x751   :  { %3371 = vmatpush3.bf16.xpose.msk.msra.mxu1 %vm4083_vm11, %v3366_v35 }
 0x752   :  { %3374 = vmatprep.subr.msk.bf16.mxu1 %vm4083_vm11, %v3372_v62 }
 0x759   :  { %3377 = vmatpush3.bf16.xpose.msk.msra.mxu1 %vm4083_vm11, %v3372_v62 }
 0x760   :  { %3187 = vmatmul.mubr.msk.f32.vlgmr.msra.gmra.mrb[32].mxu1 %vm523_vm3, %v1929_v44 }
 0x81b   :  { %v4232_v41 = vpop.f32.mrb[30].mxu1 }
 0x81c   :  { %v4234_v1 = vpop.f32.mrb[31].mxu1 }
 0x833   :  { %v3188_v2 = vpop.f32.mrb[32].mxu1 }
 0x834   :  { %v2034_v6 = vmul.f32 0.5, %v3188_v2  ;;  %v2024_v8 = vpop.f32.mrb[33].mxu1 }
 0x835   :  { %v2033_v9 = vmul.f32 0.5, %v2024_v8 }
 0x836   :  { %v2036_v15 = vadd.f32 %v2034_v6, %v4130_v60 }
 0x837   :  { %v2035_v10 = vadd.f32 %v2033_v9, %v4134_v19 }
 0x838   :  { %v2040_v23 = vsel %vm1555_vm14, %v2036_v15, -inf }
 0x839   :  { %2041 = vmax.xlane.f32.xlu0 %v2040_v23  ;;  %v2037_v25 = vsel %vm1555_vm14, %v2035_v10, -inf }
 0x83a   :  { %2038 = vmax.xlane.f32.xlu1 %v2037_v25 }
 0x84b   :  { %3504 = vrot.lane.b32.xlu1 %v4145_v11, %s3666_s15 }
 0x84f   :  { %3499 = vrot.lane.b32.xlu0 %v4143_v5, %s3666_s15  ;;  %3509 = vrot.lane.b32.xlu1 %v4149_v13, %s3666_s15 }
 0x8c6   :  { %v2042_v26 = vpop.xlane.xlu0 %2041 }
 0x8c7   :  { %v2044_v27 = vsub.f32 %v2036_v15, %v2042_v26  ;;  %v2039_v28 = vpop.xlane.xlu1 %2038 }
 0x8c8   :  { %v2043_v30 = vsub.f32 %v2035_v10, %v2039_v28 }
 0x8c9   :  { %v2047_v31 = vmul.f32 1.442695, %v2044_v27 }
 0x8ca   :  { %v2045_v33 = vmul.f32 1.442695, %v2043_v30  ;;  %v3500_v34 = vpop.permute.xlu0 %3499 }
 0x8cb   :  { %3607 = vpow2.f32 %v2047_v31  ;;  %v3502_v36 = vunpack.i.h.bf16 %v3500_v34  ;;  %v3501_v37 = vunpack.i.l.bf16 %v3500_v34  ;;  %v3505_v39 = vpop.permute.xlu1 %3504 }
 0x8cc   :  { %3609 = vpow2.f32 %v2045_v33  ;;  %v3507_v40 = vunpack.i.h.bf16 %v3505_v39  ;;  %v3506_v42 = vunpack.i.l.bf16 %v3505_v39 }
 0x8cd   :  { %v3378_v46 = vpack.c.bf16 %v3502_v36, %v3501_v37 }
 0x8ce   :  { %v3382_v43 = vpack.c.bf16 %v3507_v40, %v3506_v42 }
 0x8cf   :  { %3379 = vmatprep.subr.bf16.mxu0 %v3378_v46  ;;  %v3510_v49 = vpop.permute.xlu1 %3509 }
 0x8d0   :  { %v3512_v48 = vunpack.i.h.bf16 %v3510_v49  ;;  %v3511_v50 = vunpack.i.l.bf16 %v3510_v49  ;;  %3381 = vmatpush3.bf16.msra.mxu0 %v3378_v46 }
 0x8d1   :  { %3383 = vmatprep.subr.bf16.mxu0 %v3382_v43 }
 0x8d2   :  { %v3386_v52 = vpack.c.bf16 %v3512_v48, %v3511_v50 }
 0x8d4   :  { %3385 = vmatpush3.bf16.msra.mxu0 %v3382_v43 }
 0x8d5   :  { %v3608_v53 = vpop.eup %3607  ;;  %3387 = vmatprep.subr.bf16.mxu0 %v3386_v52 }
 0x8d6   :  { %v3610_v14 = vpop.eup %3609  ;;  %v2050_v54 = vmul.f32 %v3608_v53, %v4166_v47 }
 0x8d7   :  { %v2049_v51 = vmul.f32 %v3610_v14, %v4160_v45 }
 0x8d8   :  { %3389 = vmatpush3.bf16.msra.mxu0 %v3386_v52  ;;  %v2054_v55 = vsel %vm1555_vm14, %v2050_v54, 0.0 }
 0x8d9   :  { %2055 = vadd.xlane.f32.xlu1 %v2054_v55  ;;  %v2051_v22 = vsel %vm1555_vm14, %v2049_v51, 0.0  ;;  %v2430_v55 = vld [vmem:[%s4371_s19] sm:$0xff] }
 0x8da   :  { %2052 = vadd.xlane.f32.xlu0 %v2051_v22  ;;  %v2431_v22 = vld [vmem:[%s4371_s19 + $0x8] sm:$0xff] }
 0x8ea   :  { %3519 = vrot.lane.b32.xlu1 %v4093_v16, %s3667_s3 }
 0x8ee   :  { %2177 = vrot.lane.b32.xlu1 %v3995_v0, %s3667_s3 }
 0x8f0   :  { %3514 = vrot.lane.b32.xlu0 %v4087_v7, %s3667_s3 }
 0x8f4   :  { %3524 = vrot.lane.b32.xlu0 %v4097_v12, %s3667_s3 }
 0x8f8   :  { %2179 = vrot.lane.b32.xlu0 %v3993_v63, %s3667_s3 }
 0x966   :  { %v2056_v24 = vpop.xlane.xlu1 %2055 }
 0x967   :  { %vm2058_vm5 = vcmp.gt.f32.partialorder %v2056_v24, 0.0  ;;  %v2053_v57 = vpop.xlane.xlu0 %2052 }
 0x968   :  { %v2060_v58 = vsel %vm2058_vm5, %v2056_v24, 1.0  ;;  %vm2057_vm6 = vcmp.gt.f32.partialorder %v2053_v57, 0.0 }
 0x969   :  { %3611 = vrcp.f32 %v2060_v58  ;;  %v2059_v29 = vsel %vm2057_vm6, %v2053_v57, 1.0 }
 0x96a   :  { %3613 = vrcp.f32 %v2059_v29  ;;  %v3520_v0 = vpop.permute.xlu1 %3519 }
 0x96b   :  { %v3515_v59 = vpop.permute.xlu0 %3514  ;;  %v3522_v17 = vunpack.i.h.bf16 %v3520_v0  ;;  %v3521_v63 = vunpack.i.l.bf16 %v3520_v0 }
 0x96c   :  { %v3517_v32 = vunpack.i.h.bf16 %v3515_v59  ;;  %v3516_v56 = vunpack.i.l.bf16 %v3515_v59  ;;  %v3420_v59 = vpack.c.bf16 %v2431_v22, %v2430_v55 }
 0x96d   :  { %v3396_v35 = vpack.c.bf16 %v3522_v17, %v3521_v63  ;;  %v3636_v17 = vld [vmem:[%s4395_s28 + $0x8] sm:$0xff] }
 0x96e   :  { %v3390_v16 = vpack.c.bf16 %v3517_v32, %v3516_v56  ;;  %v2178_v20 = vpop.permute.xlu1 %2177  ;;  %v2432_v56 = vld [vmem:[%s4371_s19 + $0x10] sm:$0xff] }
 0x96f   :  { %v3525_v18 = vpop.permute.xlu0 %3524 }
 0x970   :  { %3392 = vmatprep.subr.msk.bf16.mxu0 %vm4083_vm11, %v3390_v16  ;;  %v3527_v38 = vunpack.i.h.bf16 %v3525_v18  ;;  %v3526_v21 = vunpack.i.l.bf16 %v3525_v18  ;;  %v2539_v18 = vld [vmem:[%s4373_s21 + $0x8] sm:$0xff] }
 0x972   :  { %v3402_v62 = vpack.c.bf16 %v3527_v38, %v3526_v21  ;;  %v2540_v21 = vld [vmem:[%s4373_s21 + $0x10] sm:$0xff] }
 0x973   :  { %v3612_v7 = vpop.eup %3611  ;;  %v2180_v44 = vpop.permute.xlu0 %2179 }
 0x974   :  { %v3614_v12 = vpop.eup %3613  ;;  %v2066_v3 = vmul.f32 %v3612_v7, %v2050_v54 }
 0x975   :  { %v2065_v61 = vmul.f32 %v3614_v12, %v2049_v51  ;;  %v3635_v12 = vld [vmem:[%s4395_s28] sm:$0xff] }
 0x977   :  { %3201 = vmatprep.mubr.msk.f32.mxu0 %vm1555_vm14, %v2065_v61 }
 0x978   :  { %3202 = vmatmul.mubr.msk.f32.vlgmr.msra.gmra.mrb[30].mxu0 %vm1555_vm14, %v2066_v3 }
 0x979   :  { %3395 = vmatpush3.bf16.xpose.msk.msra.mxu0 %vm4083_vm11, %v3390_v16  ;;  %3216 = vmatprep.mubr.msk.f32.mxu0 %vm523_vm3, %v2178_v20  ;;  %v2433_v16 = vld [vmem:[%s4371_s19 + $0x18] sm:$0xff]  ;;  %s3671_s19 = smov 24   ;;  %v2538_v20 = vld [vmem:[%s4373_s21] sm:$0xff] }
 0x97a   :  { %3398 = vmatprep.subr.msk.bf16.mxu0 %vm4083_vm11, %v3396_v35  ;;  %v3424_v7 = vpack.c.bf16 %v2433_v16, %v2432_v56  ;;  %v3428_v38 = vpack.c.bf16 %v2539_v18, %v2538_v20 }
 0x981   :  { %3401 = vmatpush3.bf16.xpose.msk.msra.mxu0 %vm4083_vm11, %v3396_v35 }
 0x982   :  { %3404 = vmatprep.subr.msk.bf16.mxu0 %vm4083_vm11, %v3402_v62 }
 0x989   :  { %3407 = vmatpush3.bf16.xpose.msk.msra.mxu0 %vm4083_vm11, %v3402_v62  ;;  %v2541_v62 = vld [vmem:[%s4373_s21 + $0x18] sm:$0xff] }
 0x98a   :  { %3429 = vmatprep.subr.bf16.mxu0 %v3428_v38 }
 0x990   :  { %3217 = vmatmul.mubr.msk.f32.vlgmr.msra.gmra.mrb[32].mxu0 %vm523_vm3, %v2180_v44  ;;  %v3432_v44 = vpack.c.bf16 %v2541_v62, %v2540_v21 }
 0x991   :  { %3431 = vmatpush3.bf16.msra.mxu0 %v3428_v38 }
 0x992   :  { %3433 = vmatprep.subr.bf16.mxu0 %v3432_v44 }
 0x995   :  { %3435 = vmatpush3.bf16.msra.mxu0 %v3432_v44 }
 0xa4b   :  { %v3203_v2 = vpop.f32.mrb[30].mxu0 }
 0xa4c   :  { %v2157_v6 = vpop.f32.mrb[31].mxu0 }
 0xa63   :  { %v3218_v8 = vpop.f32.mrb[32].mxu0 }
 0xa64   :  { %v2285_v9 = vmul.f32 0.5, %v3218_v8  ;;  %v2275_v15 = vpop.f32.mrb[33].mxu0  ;;  %v2815_v8 = vld [vmem:[%s4372_s20] ss:$0 sm:$0xff] }
 0xa65   :  { %v2284_v10 = vmul.f32 0.5, %v2275_v15 }
 0xa66   :  { %v2287_v23 = vadd.f32 %v2285_v9, %v4130_v60 }
 0xa67   :  { %v2286_v25 = vadd.f32 %v2284_v10, %v4134_v19 }
 0xa68   :  { %v2291_v26 = vsel %vm1555_vm14, %v2287_v23, -inf }
 0xa69   :  { %2292 = vmax.xlane.f32.xlu0 %v2291_v26  ;;  %v2288_v27 = vsel %vm1555_vm14, %v2286_v25, -inf }
 0xa6a   :  { %2289 = vmax.xlane.f32.xlu1 %v2288_v27 }
 0xaf6   :  { %v2293_v4 = vpop.xlane.xlu0 %2292 }
 0xaf7   :  { %v2295_v28 = vsub.f32 %v2287_v23, %v2293_v4  ;;  %v2290_v30 = vpop.xlane.xlu1 %2289 }
 0xaf8   :  { %v2294_v31 = vsub.f32 %v2286_v25, %v2290_v30 }
 0xaf9   :  { %v2298_v33 = vmul.f32 1.442695, %v2295_v28 }
 0xafa   :  { %v2296_v34 = vmul.f32 1.442695, %v2294_v31 }
 0xafb   :  { %3615 = vpow2.f32 %v2298_v33 }
 0xafc   :  { %3617 = vpow2.f32 %v2296_v34 }
 0xb05   :  { %v3616_v36 = vpop.eup %3615 }
 0xb06   :  { %v3618_v37 = vpop.eup %3617  ;;  %v2301_v60 = vmul.f32 %v3616_v36, %v4166_v47 }
 0xb07   :  { %v2300_v19 = vmul.f32 %v3618_v37, %v4160_v45 }
 0xb08   :  { %v2305_v39 = vsel %vm1555_vm14, %v2301_v60, 0.0 }
 0xb09   :  { %2306 = vadd.xlane.f32.xlu1 %v2305_v39  ;;  %v2302_v40 = vsel %vm1555_vm14, %v2300_v19, 0.0 }
 0xb0a   :  { %2303 = vadd.xlane.f32.xlu0 %v2302_v40 }
 0xb1a   :  { %3534 = vrot.lane.b32.xlu1 %v4145_v11, %s3668_s11 }
 0xb1e   :  { %3539 = vrot.lane.b32.xlu1 %v4149_v13, %s3668_s11 }
 0xb20   :  { %3529 = vrot.lane.b32.xlu0 %v4143_v5, %s3668_s11 }
 0xb22   :  { %1919 = vrot.lane.b32.xlu1 %v4232_v41, %s3669_s14 }
 0xb24   :  { %1917 = vrot.lane.b32.xlu0 %v4234_v1, %s3669_s14 }
 0xb26   :  { %2170 = vrot.lane.b32.xlu1 %v3203_v2, %s3670_s10 }
 0xb28   :  { %2168 = vrot.lane.b32.xlu0 %v2157_v6, %s3670_s10 }
 0xb96   :  { %v2307_v45 = vpop.xlane.xlu1 %2306 }
 0xb97   :  { %vm2309_vm3 = vcmp.gt.f32.partialorder %v2307_v45, 0.0  ;;  %v2304_v47 = vpop.xlane.xlu0 %2303 }
 0xb98   :  { %vm2308_vm7 = vcmp.gt.f32.partialorder %v2304_v47, 0.0  ;;  %v2311_v11 = vsel %vm2309_vm3, %v2307_v45, 1.0 }
 0xb99   :  { %v2310_v42 = vsel %vm2308_vm7, %v2304_v47, 1.0 }
 0xb9a   :  { %3619 = vrcp.f32 %v2310_v42  ;;  %v3535_v13 = vpop.permute.xlu1 %3534 }
 0xb9b   :  { %v3530_v46 = vpop.permute.xlu0 %3529  ;;  %v3537_v5 = vunpack.i.h.bf16 %v3535_v13  ;;  %v3536_v43 = vunpack.i.l.bf16 %v3535_v13  ;;  %3621 = vrcp.f32 %v2311_v11 }
 0xb9c   :  { %v3532_v49 = vunpack.i.h.bf16 %v3530_v46  ;;  %v3531_v48 = vunpack.i.l.bf16 %v3530_v46 }
 0xb9d   :  { %v3412_v52 = vpack.c.bf16 %v3537_v5, %v3536_v43  ;;  %v2820_v43 = vld [vmem:[%s4374_s22] ss:$0 sm:$0xff] }
 0xb9e   :  { %v3408_v41 = vpack.c.bf16 %v3532_v49, %v3531_v48  ;;  %v3540_v1 = vpop.permute.xlu1 %3539 }
 0xb9f   :  { %v1918_v50 = vpop.permute.xlu0 %1917  ;;  %v3542_v53 = vunpack.i.h.bf16 %v3540_v1  ;;  %v3541_v14 = vunpack.i.l.bf16 %v3540_v1 }
 0xba0   :  { %1924 = vst.msk [vmem:[#allocation2] sm:$0xff] %vm1923_vm8, %v1918_v50  ;;  %3409 = vmatprep.subr.bf16.mxu1 %v3408_v41 }
 0xba1   :  { %3411 = vmatpush3.bf16.msra.mxu1 %v3408_v41  ;;  %v3416_v57 = vpack.c.bf16 %v3542_v53, %v3541_v14 }
 0xba2   :  { %v1920_v54 = vpop.permute.xlu1 %1919  ;;  %3413 = vmatprep.subr.bf16.mxu1 %v3412_v52 }
 0xba3   :  { %1925 = vst.msk [vmem:[#allocation2 + $0x8] sm:$0xff] %vm1923_vm8, %v1920_v54  ;;  %v2169_v51 = vpop.permute.xlu0 %2168 }
 0xba4   :  { %v3620_v24 = vpop.eup %3619  ;;  %2175 = vst.msk [vmem:[#allocation2] sm:$0xff] %vm2174_vm9, %v2169_v51 }
 0xba5   :  { %3415 = vmatpush3.bf16.msra.mxu1 %v3412_v52  ;;  %v2316_v58 = vmul.f32 %v3620_v24, %v2300_v19  ;;  %v3622_v32 = vpop.eup %3621 }
 0xba6   :  { %v2171_v29 = vpop.permute.xlu1 %2170  ;;  %3417 = vmatprep.subr.bf16.mxu1 %v3416_v57  ;;  %v2317_v0 = vmul.f32 %v3622_v32, %v2301_v60 }
 0xba7   :  { %2176 = vst.msk [vmem:[#allocation2 + $0x8] sm:$0xff] %vm2174_vm9, %v2171_v29  ;;  %3231 = vmatprep.mubr.msk.f32.mxu1 %vm1555_vm14, %v2316_v58 }
 0xba9   :  { %3419 = vmatpush3.bf16.msra.mxu1 %v3416_v57 }
 0xbaa   :  { %3421 = vmatprep.subr.bf16.mxu1 %v3420_v59 }
 0xbac   :  { %3232 = vmatmul.mubr.msk.f32.vlgmr.msra.gmra.mrb[34].mxu1 %vm1555_vm14, %v2317_v0 }
 0xbad   :  { %3423 = vmatpush3.bf16.msra.mxu1 %v3420_v59  ;;  %3242 = vmatprep.mubr.msk.f32.mxu1 %vm93_vm0, %v3635_v12 }
 0xbae   :  { %3425 = vmatprep.subr.bf16.mxu1 %v3424_v7 }
 0xbb1   :  { %3427 = vmatpush3.bf16.msra.mxu1 %v3424_v7 }
 0xbb4   :  { %3243 = vmatmul.mubr.msk.f32.vlgmr.msra.gmra.mrb[36].mxu1 %vm93_vm0, %v3636_v17  ;;  %v2823_v17 = vld [vmem:[%s4375_s23] ss:$0 sm:$0xff] }
 0xc7f   :  { %v3233_v63 = vpop.f32.mrb[34].mxu1 }
 0xc80   :  { %2421 = vrot.lane.b32.xlu1 %v3233_v63, %s3671_s19  ;;  %v2408_v61 = vpop.f32.mrb[35].mxu1 }
 0xc81   :  { %2419 = vrot.lane.b32.xlu0 %v2408_v61, %s3671_s19  ;;  %v2824_v61 = vld [vmem:[%s4376_s24] ss:$0 sm:$0xff] }
 0xc87   :  { %v3244_v3 = vpop.f32.mrb[36].mxu1 }
 0xc88   :  { %v2507_v35 = vpop.f32.mrb[37].mxu1  ;;  %v2513_v9 = vadd.f32 %v3244_v3, %v2815_v8 }
 0xc89   :  { %v2508_v15 = vadd.f32 %v2815_v8, %v2507_v35 }
 0xcf2   :  { %v2422_v2 = vpop.permute.xlu1 %2421 }
 0xcf3   :  { %2427 = vst.msk [vmem:[#allocation2 + $0x8] sm:$0xff] %vm2425_vm10, %v2422_v2  ;;  %v2420_v6 = vpop.permute.xlu0 %2419 }
 0xcf4   :  { %2426 = vst.msk [vmem:[#allocation2] sm:$0xff] %vm2425_vm10, %v2420_v6 }
 0xcfa   :  { %v2429_v10 = vld [vmem:[#allocation2 + $0x8] sm:$0xff] }
 0xcfb   :  { %v2517_v23 = vadd.f32 %v2513_v9, %v2429_v10  ;;  %v2428_v25 = vld [vmem:[#allocation2] sm:$0xff] }
 0xcfc   :  { %v2516_v26 = vadd.f32 %v2508_v15, %v2428_v25 }
 0xcfd   :  { %v2521_v27 = vand.u32 2147483647, %v2517_v23  ;;  %v2519_v40 = vmax.f32 %v2517_v23, 0.0 }
 0xcfe   :  { %v2520_v4 = vand.u32 2147483647, %v2516_v26  ;;  %v2518_v47 = vmax.f32 %v2516_v26, 0.0 }
 0xcff   :  { %v2523_v28 = vsub.f32 0.0, %v2521_v27 }
 0xd00   :  { %v2522_v30 = vsub.f32 0.0, %v2520_v4 }
 0xd01   :  { %v2526_v31 = vmul.f32 1.442695, %v2523_v28 }
 0xd02   :  { %v2524_v33 = vmul.f32 1.442695, %v2522_v30 }
 0xd03   :  { %3623 = vpow2.f32 %v2526_v31 }
 0xd04   :  { %3625 = vpow2.f32 %v2524_v33 }
 0xd0d   :  { %v3624_v34 = vpop.eup %3623 }
 0xd0e   :  { %v3626_v36 = vpop.eup %3625  ;;  %v2529_v37 = vadd.f32 1.0, %v3624_v34 }
 0xd0f   :  { %v2528_v60 = vadd.f32 1.0, %v3626_v36 }
 0xd10   :  { %3627 = vlog2.f32 %v2529_v37 }
 0xd11   :  { %3629 = vlog2.f32 %v2528_v60 }
 0xd1a   :  { %v3628_v19 = vpop.eup %3627 }
 0xd1b   :  { %v3630_v39 = vpop.eup %3629  ;;  %v2533_v45 = vmul.f32 0.6931472, %v3628_v19 }
 0xd1c   :  { %v2531_v42 = vmul.f32 0.6931472, %v3630_v39 }
 0xd1d   :  { %v2535_v11 = vadd.f32 %v2533_v45, %v2519_v40 }
 0xd1e   :  { %v2534_v13 = vadd.f32 %v2531_v42, %v2518_v47 }
 0xd1f   :  { %v2819_v5 = vadd.f32 -0.6931472, %v2535_v11 }
 0xd20   :  { %v2818_v46 = vadd.f32 -0.6931472, %v2534_v13 }
 0xd22   :  { %3253 = vmatprep.mubr.msk.f32.mxu0 %vm93_vm0, %v2818_v46 }
 0xd23   :  { %3254 = vmatmul.mubr.msk.f32.vlgmr.msra.gmra.mrb[34].mxu0 %vm93_vm0, %v2819_v5 }
 0xdf6   :  { %v3255_v49 = vpop.f32.mrb[34].mxu0 }
 0xdf7   :  { %v2627_v48 = vadd.f32 %v3255_v49, %v2820_v43  ;;  %v2621_v41 = vpop.f32.mrb[35].mxu0 }
 0xdf8   :  { %v2622_v1 = vadd.f32 %v2820_v43, %v2621_v41 }
 0xdf9   :  { %v2633_v50 = vsel %vm93_vm0, %v2627_v48, 0.0 }
 0xdfa   :  { %2634 = vadd.xlane.f32.xlu1 %v2633_v50  ;;  %v2630_v52 = vsel %vm93_vm0, %v2622_v1, 0.0 }
 0xdfb   :  { %2631 = vadd.xlane.f32.xlu0 %v2630_v52 }
 0xe87   :  { %v2635_v53 = vpop.xlane.xlu1 %2634 }
 0xe88   :  { %v2638_v14 = vmul.f32 0.03125, %v2635_v53  ;;  %v2632_v54 = vpop.xlane.xlu0 %2631 }
 0xe89   :  { %v2637_v51 = vmul.f32 0.03125, %v2632_v54 }
 0xe8a   :  { %v2640_v55 = vsub.f32 %v2627_v48, %v2638_v14 }
 0xe8b   :  { %v2639_v22 = vsub.f32 %v2622_v1, %v2637_v51 }
 0xe8c   :  { %v2642_v58 = vmul.f32 %v2640_v55, %v2640_v55 }
 0xe8d   :  { %v2641_v24 = vmul.f32 %v2639_v22, %v2639_v22 }
 0xe8e   :  { %v2646_v29 = vsel %vm93_vm0, %v2642_v58, 0.0 }
 0xe8f   :  { %v2643_v57 = vsel %vm93_vm0, %v2641_v24, 0.0 }
 0xe90   :  { %2644 = vadd.xlane.f32.xlu0 %v2643_v57 }
 0xe94   :  { %2647 = vadd.xlane.f32.xlu0 %v2646_v29 }
 0xf1d   :  { %v2645_v59 = vpop.xlane.xlu0 %2644 }
 0xf1e   :  { %v2649_v32 = vmul.f32 0.03125, %v2645_v59 }
 0xf20   :  { %v2651_v56 = vadd.f32 1e-05, %v2649_v32 }
 0xf21   :  { %v2648_v16 = vpop.xlane.xlu0 %2647 }
 0xf22   :  { %3631 = vrsqrt.f32 %v2651_v56  ;;  %v2650_v0 = vmul.f32 0.03125, %v2648_v16 }
 0xf24   :  { %v2652_v7 = vadd.f32 1e-05, %v2650_v0 }
 0xf26   :  { %3633 = vrsqrt.f32 %v2652_v7 }
 0xf2c   :  { %v3632_v12 = vpop.eup %3631 }
 0xf2d   :  { %v2655_v63 = vmul.f32 %v3632_v12, %v2639_v22 }
 0xf2f   :  { %v2664_v3 = vmul.f32 %v2823_v17, %v2655_v63 }
 0xf30   :  { %v3634_v35 = vpop.eup %3633 }
 0xf31   :  { %v2656_v20 = vmul.f32 %v3634_v35, %v2640_v55  ;;  %v2673_v18 = vadd.f32 %v2824_v61, %v2664_v3 }
 0xf33   :  { %v2665_v38 = vmul.f32 %v2823_v17, %v2656_v20  ;;  %2675 = vst.msk [vmem:[#allocation3] sm:$0xff] %vm93_vm0, %v2673_v18 }
 0xf35   :  { %v2674_v21 = vadd.f32 %v2824_v61, %v2665_v38 }
 0xf37   :  { %2676 = vst.msk [vmem:[#allocation3 + $0x8] sm:$0xff] %vm93_vm0, %v2674_v21 }
 0xf38   :  { %3648 = shalt.err (!%p3645_p4)
}
 0xf39   :  { %s3649_s27 = scalar_lea.hbm %s4377_s25, 256 }
 0xf3a   :  { %p3650_p5 = scmp.ne.s32.totalorder %s4377_s25, %s3649_s27  ;;  %p3653_p6 = scmp.lt.u32.totalorder %s3649_s27, %s4377_s25 }
 0xf3c   :  { %p3655_p7 = pnand %p3653_p6, %p3650_p5 }
 0xf3e   :  { %3658 = shalt.err (!%p3655_p7)
}
 0xf3f   :  { %s3673_s17 = smov 128  }
 0xf40   :  { %2688 = dma.vmem_to_hbm [thread:$0]  %s2683_s29, 256, %s4377_s25, [#allocation4], %s3673_s17, %s3673_s17, %s3669_s14  }
 0xf41   :  { %3659 = dma.done.wait [#allocation4], 256  }
 0xf42   :  { %3660 = vsyncadd [#allocation4], 4294967040 }
 0xf43   :  { %2692 = vsyncpa [#allocation4], 1 }

</bundles_post_ra>
